<compile_context>
chip_gen: v5e
topology: v5e:2x2
jax: 0.10.0
libtpu: 0.0.40
codegen_flags: <defaults>
</compile_context>

<pallas_src>
import math
import functools

import jax
import jax.numpy as jnp
from jax.experimental import pallas as pl
from jax.experimental.pallas import tpu as pltpu

_NEG_LARGE = -1e30   # finite "-inf" so padded KV columns never produce NaNs


# ------------------------------ fused kernel -------------------------------

def _mhca_kernel(x_ref, k_ref, v_ref, wq_ref, wpT_ref, bq_ref, bp_ref,
                 y_ref,
                 q_scr, m_scr, l_scr, acc_scr,
                 *, scale, num_heads, head_dim, lk_valid, lk_tile, mask_kv):
    kv = pl.program_id(1)
    n_kv = pl.num_programs(1)
    H, Dh = num_heads, head_dim

    # Contract dim 1 of both operands: (m, C) x (n, C) -> (m, n) == a @ W^T,
    # so the MXU consumes the PyTorch-layout weight directly (no transpose).
    dn_t = (((1,), (1,)), ((), ()))

    # ---- per-lq-tile init: project q for ALL heads at once, reset stats ----
    @pl.when(kv == 0)
    def _():
        q = jax.lax.dot_general(x_ref[...], wq_ref[...], dn_t,
                                preferred_element_type=jnp.float32)
        q_scr[...] = ((q + bq_ref[...]) * scale).astype(q_scr.dtype)
        m_scr[...] = jnp.full_like(m_scr, _NEG_LARGE)
        l_scr[...] = jnp.zeros_like(l_scr)
        acc_scr[...] = jnp.zeros_like(acc_scr)

    k = k_ref[...]           # (lk_tile, C) pre-projected K (wrapper)
    v = v_ref[...]           # (lk_tile, C) pre-projected V (wrapper)

    if mask_kv:  # static: only emitted when the KV length was padded
        col = jax.lax.broadcasted_iota(jnp.int32, (1, lk_tile), 1) + kv * lk_tile
        valid = col < lk_valid                                   # (1, lk_tile)

    # ---- per-head flash-style online softmax over this KV tile -------------
    for h in range(H):                    # static unroll; H is compile-time
        sl = slice(h * Dh, (h + 1) * Dh)
        s = jax.lax.dot_general(q_scr[:, sl], k[:, sl], dn_t,
                                preferred_element_type=jnp.float32)  # (lq, lk)
        if mask_kv:
            s = jnp.where(valid, s, _NEG_LARGE)
        m_prev = m_scr[:, h:h + 1]
        m_new = jnp.maximum(m_prev, jnp.max(s, axis=-1, keepdims=True))
        alpha = jnp.exp(m_prev - m_new)
        p = jnp.exp(s - m_new)
        if mask_kv:
            p = jnp.where(valid, p, 0.0)
        l_scr[:, h:h + 1] = (alpha * l_scr[:, h:h + 1]
                             + jnp.sum(p, axis=-1, keepdims=True))
        acc_scr[:, sl] = alpha * acc_scr[:, sl] + jnp.dot(
            p.astype(v.dtype), v[:, sl], preferred_element_type=jnp.float32)
        m_scr[:, h:h + 1] = m_new

    # ---- epilogue: normalize each head slab, one full-width output proj ----
    @pl.when(kv == n_kv - 1)
    def _():
        for h in range(H):
            sl = slice(h * Dh, (h + 1) * Dh)
            acc_scr[:, sl] = acc_scr[:, sl] * pl.reciprocal(
                l_scr[:, h:h + 1], approx=False)
        o = acc_scr[...].astype(wpT_ref.dtype)
        y = jnp.dot(o, wpT_ref[...], preferred_element_type=jnp.float32)
        y_ref[...] = (y + bp_ref[...]).astype(y_ref.dtype)


# ------------------------------- wrapper ------------------------------------

def _round_up(a, b):
    return (a + b - 1) // b * b


def mhca_forward(x, cond, params, num_heads, *, lq_tile=256, lk_tile=256,
                 mxu_dtype=None, vmem_limit_bytes=None):
    """Fused MultiHeadCrossAttention forward (mask=None, dropout=identity).

    `mxu_dtype`: dtype of the MXU operands (pass jnp.bfloat16 in production);
    defaults to x.dtype.  Softmax math / accumulation stay in float32.
    """
    B, N, C = x.shape
    Bc, M, Cc = cond.shape
    assert (Bc, Cc) == (B, C)
    H = num_heads
    assert C % H == 0, "d_model must be divisible by num_heads"
    Dh = C // H

    out_dtype = x.dtype
    mxu_dtype = jnp.dtype(mxu_dtype) if mxu_dtype is not None else jnp.dtype(out_dtype)

    Lq, Lk = B * N, B * M
    x2 = x.reshape(Lq, C).astype(mxu_dtype)
    c2 = cond.reshape(Lk, C)

    # KV projection once, outside the kernel (cond is short for cross-attn);
    # removes the per-(lq-tile x head) re-projection and cond re-fetch.
    kvw = params["wkv"].T.astype(mxu_dtype)                            # (C, 2C)
    kv = (jnp.dot(c2.astype(mxu_dtype), kvw, preferred_element_type=jnp.float32)
          + params["bkv"].astype(jnp.float32))                         # (Lk, 2C)
    k_all = kv[:, :C].astype(mxu_dtype)
    v_all = kv[:, C:].astype(mxu_dtype)

    # Tile sizes (sublane aligned). Padded keys are masked in-kernel; padded
    # query rows are sliced off at the end.
    lq_tile = _round_up(min(lq_tile, Lq), 8)
    lk_tile = _round_up(min(lk_tile, Lk), 8)
    Lq_pad = _round_up(Lq, lq_tile)
    Lk_pad = _round_up(Lk, lk_tile)
    if Lq_pad != Lq:
        x2 = jnp.pad(x2, ((0, Lq_pad - Lq), (0, 0)))
    if Lk_pad != Lk:
        k_all = jnp.pad(k_all, ((0, Lk_pad - Lk), (0, 0)))
        v_all = jnp.pad(v_all, ((0, Lk_pad - Lk), (0, 0)))

    # One-time weight/bias layout (tiny; resident in VMEM for the whole grid).
    wq = params["wq"].astype(mxu_dtype)          # (C, C)
    wpT = params["wp"].T.astype(mxu_dtype)       # (C, C):  o @ wpT == o @ Wp^T
    bq2 = params["bq"].reshape(1, C).astype(jnp.float32)
    bp2 = params["bp"].reshape(1, C).astype(jnp.float32)

    grid = (Lq_pad // lq_tile, Lk_pad // lk_tile)
    scale = 1.0 / math.sqrt(Dh)

    kernel = functools.partial(
        _mhca_kernel, scale=scale, num_heads=H, head_dim=Dh,
        lk_valid=Lk, lk_tile=lk_tile, mask_kv=(Lk_pad != Lk))

    y = pl.pallas_call(
        kernel,
        grid=grid,
        in_specs=[
            pl.BlockSpec((lq_tile, C), lambda i, k: (i, 0)),   # x rows
            pl.BlockSpec((lk_tile, C), lambda i, k: (k, 0)),   # K rows (pre-proj)
            pl.BlockSpec((lk_tile, C), lambda i, k: (k, 0)),   # V rows (pre-proj)
            pl.BlockSpec((C, C), lambda i, k: (0, 0)),         # Wq    (resident)
            pl.BlockSpec((C, C), lambda i, k: (0, 0)),         # Wp^T  (resident)
            pl.BlockSpec((1, C), lambda i, k: (0, 0)),         # bq    (resident)
            pl.BlockSpec((1, C), lambda i, k: (0, 0)),         # bp    (resident)
        ],
        out_specs=pl.BlockSpec((lq_tile, C), lambda i, k: (i, 0)),
        out_shape=jax.ShapeDtypeStruct((Lq_pad, C), out_dtype),
        scratch_shapes=[
            pltpu.VMEM((lq_tile, C), mxu_dtype),     # q, all heads (pre-scaled)
            pltpu.VMEM((lq_tile, H), jnp.float32),   # running max per head
            pltpu.VMEM((lq_tile, H), jnp.float32),   # running denom per head
            pltpu.VMEM((lq_tile, C), jnp.float32),   # running p @ v (all heads)
        ],
        compiler_params=pltpu.CompilerParams(
            dimension_semantics=("parallel", "arbitrary"),
            vmem_limit_bytes=vmem_limit_bytes),
    )(x2, k_all, v_all, wq, wpT, bq2, bp2)

    return y[:Lq].reshape(B, N, C)


# ------------------------------ reference -----------------------------------

def mhca_reference(x, cond, params, num_heads):
    """Pure-JAX reference (exact softmax, exact divide)."""
    B, N, C = x.shape
    _, M, _ = cond.shape
    Dh = C // num_heads
    q = x.reshape(B * N, C) @ params["wq"].T + params["bq"]
    kv = cond.reshape(B * M, C) @ params["wkv"].T + params["bkv"]
    k, v = kv[:, :C], kv[:, C:]
    qh = q.reshape(B * N, num_heads, Dh).transpose(1, 0, 2)
    kh = k.reshape(B * M, num_heads, Dh).transpose(1, 0, 2)
    vh = v.reshape(B * M, num_heads, Dh).transpose(1, 0, 2)
    s = jnp.einsum("hqd,hkd->hqk", qh, kh) / math.sqrt(Dh)
    p = jax.nn.softmax(s, axis=-1)
    oh = jnp.einsum("hqk,hkd->hqd", p, vh)
    attn = oh.transpose(1, 0, 2).reshape(B * N, C)
    return (attn @ params["wp"].T + params["bp"]).reshape(B, N, C)


# --------------------------------- main --------------------------------------

if __name__ == "__main__":
    d_model = 32
    num_heads = 4
    B, N, M = 2, 16, 7     # Lq = 32, Lk = 14 (exercises the padded-KV mask path)

    key = jax.random.PRNGKey(0)
    ks = jax.random.split(key, 8)

    params = {
        "wq":  0.02 * jax.random.normal(ks[0], (d_model, d_model), jnp.float32),
        "bq":  0.02 * jax.random.normal(ks[1], (d_model,), jnp.float32),
        "wkv": 0.02 * jax.random.normal(ks[2], (2 * d_model, d_model), jnp.float32),
        "bkv": 0.02 * jax.random.normal(ks[3], (2 * d_model,), jnp.float32),
        "wp":  0.02 * jax.random.normal(ks[4], (d_model, d_model), jnp.float32),
        "bp":  0.02 * jax.random.normal(ks[5], (d_model,), jnp.float32),
    }

    x = jax.random.normal(ks[6], (B, N, d_model), jnp.float32)
    cond = jax.random.normal(ks[7], (B, M, d_model), jnp.float32)

    ref = mhca_reference(x, cond, params, num_heads)

    # Tiny tiles purely to exercise the full grid (2 lq tiles x 2 kv tiles,
    # the second kv tile partially masked); real sizes use the defaults.
    out = mhca_forward(x, cond, params, num_heads, lq_tile=16, lk_tile=8)
    out = jax.block_until_ready(out)
    assert out.shape == (B, N, d_model)
    assert jnp.allclose(out, ref, rtol=2e-3, atol=1e-4), (
        f"f32 mismatch vs reference (max abs err {jnp.max(jnp.abs(out - ref))})")

    # bf16 MXU-operand path (production configuration on v5e/v6e/v7x).
    out_bf16 = mhca_forward(x, cond, params, num_heads,
                            lq_tile=16, lk_tile=8, mxu_dtype=jnp.bfloat16)
    out_bf16 = jax.block_until_ready(out_bf16)
    assert out_bf16.shape == (B, N, d_model)
    assert bool(jnp.all(jnp.isfinite(out_bf16)))
    assert jnp.allclose(out_bf16, ref, rtol=5e-2, atol=5e-2), (
        f"bf16 mismatch vs reference (max abs err {jnp.max(jnp.abs(out_bf16 - ref))})")

    print("KERNEL_OK")
</pallas_src>

<mosaic_0001>
module attributes {stable_mosaic.version = 11 : i64} {
  func.func @_mhca_kernel(%arg0: i32, %arg1: i32, %arg2: memref<16x32xf32, #tpu.memory_space<vmem>>, %arg3: memref<8x32xf32, #tpu.memory_space<vmem>>, %arg4: memref<8x32xf32, #tpu.memory_space<vmem>>, %arg5: memref<32x32xf32, #tpu.memory_space<vmem>>, %arg6: memref<32x32xf32, #tpu.memory_space<vmem>>, %arg7: memref<1x32xf32, #tpu.memory_space<vmem>>, %arg8: memref<1x32xf32, #tpu.memory_space<vmem>>, %arg9: memref<16x32xf32, #tpu.memory_space<vmem>>, %arg10: memref<16x32xf32, #tpu.memory_space<vmem>>, %arg11: memref<16x4xf32, #tpu.memory_space<vmem>>, %arg12: memref<16x4xf32, #tpu.memory_space<vmem>>, %arg13: memref<16x32xf32, #tpu.memory_space<vmem>>) attributes {dimension_semantics = [#tpu.dimension_semantics<parallel>, #tpu.dimension_semantics<arbitrary>], iteration_bounds = array<i64: 2, 2>, scalar_prefetch = 0 : i64, scratch_operands = 4 : i64, tpu.core_type = #tpu.core_type<tc>, window_params = [{transform_indices = @transform_0, window_bounds = array<i64: 16, 32>}, {transform_indices = @transform_1, window_bounds = array<i64: 8, 32>}, {transform_indices = @transform_2, window_bounds = array<i64: 8, 32>}, {pipeline_mode = #tpu.pipeline_mode<synchronous>, transform_indices = @transform_3, window_bounds = array<i64: 32, 32>}, {pipeline_mode = #tpu.pipeline_mode<synchronous>, transform_indices = @transform_4, window_bounds = array<i64: 32, 32>}, {pipeline_mode = #tpu.pipeline_mode<synchronous>, transform_indices = @transform_5, window_bounds = array<i64: 1, 32>}, {pipeline_mode = #tpu.pipeline_mode<synchronous>, transform_indices = @transform_6, window_bounds = array<i64: 1, 32>}, {transform_indices = @transform_7, window_bounds = array<i64: 16, 32>}]} {
    %c0_i32 = arith.constant 0 : i32
    %0 = arith.cmpi eq, %arg1, %c0_i32 : i32
    %1 = arith.extui %0 : i1 to i32
    %c0_i32_0 = arith.constant 0 : i32
    %2 = arith.cmpi ne, %1, %c0_i32_0 : i32
    scf.if %2 {
      %c0_78 = arith.constant 0 : index
      %c0_79 = arith.constant 0 : index
      %150 = vector.load %arg2[%c0_78, %c0_79] : memref<16x32xf32, #tpu.memory_space<vmem>>, vector<16x32xf32>
      %c0_80 = arith.constant 0 : index
      %c0_81 = arith.constant 0 : index
      %151 = vector.load %arg5[%c0_80, %c0_81] : memref<32x32xf32, #tpu.memory_space<vmem>>, vector<32x32xf32>
      %cst_82 = arith.constant dense<0.000000e+00> : vector<16x32xf32>
      %152 = tpu.matmul %150, %151, %cst_82 {dimension_numbers = #tpu.dot_dimension_numbers<[1], [1], [0], [0], [0, 0, 1, 0], [], []>} : vector<16x32xf32>, vector<32x32xf32>, vector<16x32xf32> -> vector<16x32xf32>
      %c0_83 = arith.constant 0 : index
      %c0_84 = arith.constant 0 : index
      %153 = vector.load %arg7[%c0_83, %c0_84] : memref<1x32xf32, #tpu.memory_space<vmem>>, vector<1x32xf32>
      %154 = vector.broadcast %153 : vector<1x32xf32> to vector<16x32xf32>
      %155 = arith.addf %152, %154 : vector<16x32xf32>
      %cst_85 = arith.constant 0.353553385 : f32
      %156 = vector.broadcast %cst_85 : f32 to vector<16x32xf32>
      %157 = arith.mulf %155, %156 : vector<16x32xf32>
      %c0_86 = arith.constant 0 : index
      %c0_87 = arith.constant 0 : index
      %158 = vector.load %arg10[%c0_86, %c0_87] : memref<16x32xf32, #tpu.memory_space<vmem>>, vector<16x32xf32>
      tpu.vector_store %arg10[%c0_86, %c0_87], %157 {strides = array<i32>} : memref<16x32xf32, #tpu.memory_space<vmem>>, vector<16x32xf32>,
      %cst_88 = arith.constant -1.000000e+30 : f32
      %159 = vector.broadcast %cst_88 : f32 to vector<16x4xf32>
      %c0_89 = arith.constant 0 : index
      %c0_90 = arith.constant 0 : index
      %160 = vector.load %arg11[%c0_89, %c0_90] : memref<16x4xf32, #tpu.memory_space<vmem>>, vector<16x4xf32>
      tpu.vector_store %arg11[%c0_89, %c0_90], %159 {strides = array<i32>} : memref<16x4xf32, #tpu.memory_space<vmem>>, vector<16x4xf32>,
      %cst_91 = arith.constant 0.000000e+00 : f32
      %161 = vector.broadcast %cst_91 : f32 to vector<16x4xf32>
      %c0_92 = arith.constant 0 : index
      %c0_93 = arith.constant 0 : index
      %162 = vector.load %arg12[%c0_92, %c0_93] : memref<16x4xf32, #tpu.memory_space<vmem>>, vector<16x4xf32>
      tpu.vector_store %arg12[%c0_92, %c0_93], %161 {strides = array<i32>} : memref<16x4xf32, #tpu.memory_space<vmem>>, vector<16x4xf32>,
      %cst_94 = arith.constant 0.000000e+00 : f32
      %163 = vector.broadcast %cst_94 : f32 to vector<16x32xf32>
      %c0_95 = arith.constant 0 : index
      %c0_96 = arith.constant 0 : index
      %164 = vector.load %arg13[%c0_95, %c0_96] : memref<16x32xf32, #tpu.memory_space<vmem>>, vector<16x32xf32>
      tpu.vector_store %arg13[%c0_95, %c0_96], %163 {strides = array<i32>} : memref<16x32xf32, #tpu.memory_space<vmem>>, vector<16x32xf32>,
    } else {
    }
    %c0 = arith.constant 0 : index
    %c0_1 = arith.constant 0 : index
    %3 = vector.load %arg3[%c0, %c0_1] : memref<8x32xf32, #tpu.memory_space<vmem>>, vector<8x32xf32>
    %c0_2 = arith.constant 0 : index
    %c0_3 = arith.constant 0 : index
    %4 = vector.load %arg4[%c0_2, %c0_3] : memref<8x32xf32, #tpu.memory_space<vmem>>, vector<8x32xf32>
    %5 = tpu.iota {dimensions = array<i32: 1>} : vector<1x8xi32>
    %c8_i32 = arith.constant 8 : i32
    %6 = arith.muli %arg1, %c8_i32 : i32
    %7 = vector.broadcast %6 : i32 to vector<1x8xi32>
    %8 = arith.addi %5, %7 : vector<1x8xi32>
    %c14_i32 = arith.constant 14 : i32
    %9 = vector.broadcast %c14_i32 : i32 to vector<1x8xi32>
    %10 = arith.cmpi slt, %8, %9 : vector<1x8xi32>
    %c0_4 = arith.constant 0 : index
    %c0_5 = arith.constant 0 : index
    %11 = vector.load %arg10[%c0_4, %c0_5] : memref<16x32xf32, #tpu.memory_space<vmem>>, vector<16x8xf32>
    %12 = vector.extract_strided_slice %3 {offsets = [0, 0], sizes = [8, 8], strides = [1, 1]} : vector<8x32xf32> to vector<8x8xf32>
    %cst = arith.constant dense<0.000000e+00> : vector<16x8xf32>
    %13 = tpu.matmul %11, %12, %cst {dimension_numbers = #tpu.dot_dimension_numbers<[1], [1], [0], [0], [0, 0, 1, 0], [], []>} : vector<16x8xf32>, vector<8x8xf32>, vector<16x8xf32> -> vector<16x8xf32>
    %cst_6 = arith.constant -1.000000e+30 : f32
    %14 = vector.shape_cast %10 : vector<1x8xi1> to vector<1x8xi1>
    %15 = vector.broadcast %14 : vector<1x8xi1> to vector<16x8xi1>
    %16 = vector.broadcast %cst_6 : f32 to vector<16x8xf32>
    %17 = arith.select %15, %13, %16 : vector<16x8xi1>, vector<16x8xf32>
    %c0_7 = arith.constant 0 : index
    %c0_8 = arith.constant 0 : index
    %18 = vector.load %arg11[%c0_7, %c0_8] : memref<16x4xf32, #tpu.memory_space<vmem>>, vector<16x1xf32>
    %cst_9 = arith.constant dense<0xFF800000> : vector<16xf32>
    %19 = vector.multi_reduction <maximumf>, %17, %cst_9 [1] : vector<16x8xf32> to vector<16xf32>
    %20 = vector.shape_cast %19 : vector<16xf32> to vector<16x1xf32>
    %21 = arith.maximumf %18, %20 : vector<16x1xf32>
    %22 = arith.subf %18, %21 : vector<16x1xf32>
    %23 = math.exp %22 : vector<16x1xf32>
    %24 = vector.broadcast %21 : vector<16x1xf32> to vector<16x8xf32>
    %25 = arith.subf %17, %24 : vector<16x8xf32>
    %26 = math.exp %25 : vector<16x8xf32>
    %cst_10 = arith.constant 0.000000e+00 : f32
    %27 = vector.shape_cast %10 : vector<1x8xi1> to vector<1x8xi1>
    %28 = vector.broadcast %27 : vector<1x8xi1> to vector<16x8xi1>
    %29 = vector.broadcast %cst_10 : f32 to vector<16x8xf32>
    %30 = arith.select %28, %26, %29 : vector<16x8xi1>, vector<16x8xf32>
    %c0_11 = arith.constant 0 : index
    %c0_12 = arith.constant 0 : index
    %31 = vector.load %arg12[%c0_11, %c0_12] : memref<16x4xf32, #tpu.memory_space<vmem>>, vector<16x1xf32>
    %32 = arith.mulf %23, %31 : vector<16x1xf32>
    %cst_13 = arith.constant dense<0.000000e+00> : vector<16xf32>
    %33 = vector.multi_reduction <add>, %30, %cst_13 [1] : vector<16x8xf32> to vector<16xf32>
    %34 = vector.shape_cast %33 : vector<16xf32> to vector<16x1xf32>
    %35 = arith.addf %32, %34 : vector<16x1xf32>
    %c0_14 = arith.constant 0 : index
    %c0_15 = arith.constant 0 : index
    %36 = vector.load %arg12[%c0_14, %c0_15] : memref<16x4xf32, #tpu.memory_space<vmem>>, vector<16x1xf32>
    tpu.vector_store %arg12[%c0_14, %c0_15], %35 {strides = array<i32>} : memref<16x4xf32, #tpu.memory_space<vmem>>, vector<16x1xf32>,
    %c0_16 = arith.constant 0 : index
    %c0_17 = arith.constant 0 : index
    %37 = vector.load %arg13[%c0_16, %c0_17] : memref<16x32xf32, #tpu.memory_space<vmem>>, vector<16x8xf32>
    %38 = vector.broadcast %23 : vector<16x1xf32> to vector<16x8xf32>
    %39 = arith.mulf %38, %37 : vector<16x8xf32>
    %40 = vector.extract_strided_slice %4 {offsets = [0, 0], sizes = [8, 8], strides = [1, 1]} : vector<8x32xf32> to vector<8x8xf32>
    %cst_18 = arith.constant dense<0.000000e+00> : vector<16x8xf32>
    %41 = tpu.matmul %30, %40, %cst_18 {dimension_numbers = #tpu.dot_dimension_numbers<[1], [0], [0], [1], [0, 0, 1, 1], [], []>} : vector<16x8xf32>, vector<8x8xf32>, vector<16x8xf32> -> vector<16x8xf32>
    %42 = arith.addf %39, %41 : vector<16x8xf32>
    %c0_19 = arith.constant 0 : index
    %c0_20 = arith.constant 0 : index
    %43 = vector.load %arg13[%c0_19, %c0_20] : memref<16x32xf32, #tpu.memory_space<vmem>>, vector<16x8xf32>
    tpu.vector_store %arg13[%c0_19, %c0_20], %42 {strides = array<i32>} : memref<16x32xf32, #tpu.memory_space<vmem>>, vector<16x8xf32>,
    %c0_21 = arith.constant 0 : index
    %c0_22 = arith.constant 0 : index
    %44 = vector.load %arg11[%c0_21, %c0_22] : memref<16x4xf32, #tpu.memory_space<vmem>>, vector<16x1xf32>
    tpu.vector_store %arg11[%c0_21, %c0_22], %21 {strides = array<i32>} : memref<16x4xf32, #tpu.memory_space<vmem>>, vector<16x1xf32>,
    %c0_23 = arith.constant 0 : index
    %c8 = arith.constant 8 : index
    %45 = vector.load %arg10[%c0_23, %c8] : memref<16x32xf32, #tpu.memory_space<vmem>>, vector<16x8xf32>
    %46 = vector.extract_strided_slice %3 {offsets = [0, 8], sizes = [8, 8], strides = [1, 1]} : vector<8x32xf32> to vector<8x8xf32>
    %cst_24 = arith.constant dense<0.000000e+00> : vector<16x8xf32>
    %47 = tpu.matmul %45, %46, %cst_24 {dimension_numbers = #tpu.dot_dimension_numbers<[1], [1], [0], [0], [0, 0, 1, 0], [], []>} : vector<16x8xf32>, vector<8x8xf32>, vector<16x8xf32> -> vector<16x8xf32>
    %cst_25 = arith.constant -1.000000e+30 : f32
    %48 = vector.shape_cast %10 : vector<1x8xi1> to vector<1x8xi1>
    %49 = vector.broadcast %48 : vector<1x8xi1> to vector<16x8xi1>
    %50 = vector.broadcast %cst_25 : f32 to vector<16x8xf32>
    %51 = arith.select %49, %47, %50 : vector<16x8xi1>, vector<16x8xf32>
    %c0_26 = arith.constant 0 : index
    %c1 = arith.constant 1 : index
    %52 = vector.load %arg11[%c0_26, %c1] : memref<16x4xf32, #tpu.memory_space<vmem>>, vector<16x1xf32>
    %cst_27 = arith.constant dense<0xFF800000> : vector<16xf32>
    %53 = vector.multi_reduction <maximumf>, %51, %cst_27 [1] : vector<16x8xf32> to vector<16xf32>
    %54 = vector.shape_cast %53 : vector<16xf32> to vector<16x1xf32>
    %55 = arith.maximumf %52, %54 : vector<16x1xf32>
    %56 = arith.subf %52, %55 : vector<16x1xf32>
    %57 = math.exp %56 : vector<16x1xf32>
    %58 = vector.broadcast %55 : vector<16x1xf32> to vector<16x8xf32>
    %59 = arith.subf %51, %58 : vector<16x8xf32>
    %60 = math.exp %59 : vector<16x8xf32>
    %cst_28 = arith.constant 0.000000e+00 : f32
    %61 = vector.shape_cast %10 : vector<1x8xi1> to vector<1x8xi1>
    %62 = vector.broadcast %61 : vector<1x8xi1> to vector<16x8xi1>
    %63 = vector.broadcast %cst_28 : f32 to vector<16x8xf32>
    %64 = arith.select %62, %60, %63 : vector<16x8xi1>, vector<16x8xf32>
    %c0_29 = arith.constant 0 : index
    %c1_30 = arith.constant 1 : index
    %65 = vector.load %arg12[%c0_29, %c1_30] : memref<16x4xf32, #tpu.memory_space<vmem>>, vector<16x1xf32>
    %66 = arith.mulf %57, %65 : vector<16x1xf32>
    %cst_31 = arith.constant dense<0.000000e+00> : vector<16xf32>
    %67 = vector.multi_reduction <add>, %64, %cst_31 [1] : vector<16x8xf32> to vector<16xf32>
    %68 = vector.shape_cast %67 : vector<16xf32> to vector<16x1xf32>
    %69 = arith.addf %66, %68 : vector<16x1xf32>
    %c0_32 = arith.constant 0 : index
    %c1_33 = arith.constant 1 : index
    %70 = vector.load %arg12[%c0_32, %c1_33] : memref<16x4xf32, #tpu.memory_space<vmem>>, vector<16x1xf32>
    tpu.vector_store %arg12[%c0_32, %c1_33], %69 {strides = array<i32>} : memref<16x4xf32, #tpu.memory_space<vmem>>, vector<16x1xf32>,
    %c0_34 = arith.constant 0 : index
    %c8_35 = arith.constant 8 : index
    %71 = vector.load %arg13[%c0_34, %c8_35] : memref<16x32xf32, #tpu.memory_space<vmem>>, vector<16x8xf32>
    %72 = vector.broadcast %57 : vector<16x1xf32> to vector<16x8xf32>
    %73 = arith.mulf %72, %71 : vector<16x8xf32>
    %74 = vector.extract_strided_slice %4 {offsets = [0, 8], sizes = [8, 8], strides = [1, 1]} : vector<8x32xf32> to vector<8x8xf32>
    %cst_36 = arith.constant dense<0.000000e+00> : vector<16x8xf32>
    %75 = tpu.matmul %64, %74, %cst_36 {dimension_numbers = #tpu.dot_dimension_numbers<[1], [0], [0], [1], [0, 0, 1, 1], [], []>} : vector<16x8xf32>, vector<8x8xf32>, vector<16x8xf32> -> vector<16x8xf32>
    %76 = arith.addf %73, %75 : vector<16x8xf32>
    %c0_37 = arith.constant 0 : index
    %c8_38 = arith.constant 8 : index
    %77 = vector.load %arg13[%c0_37, %c8_38] : memref<16x32xf32, #tpu.memory_space<vmem>>, vector<16x8xf32>
    tpu.vector_store %arg13[%c0_37, %c8_38], %76 {strides = array<i32>} : memref<16x32xf32, #tpu.memory_space<vmem>>, vector<16x8xf32>,
    %c0_39 = arith.constant 0 : index
    %c1_40 = arith.constant 1 : index
    %78 = vector.load %arg11[%c0_39, %c1_40] : memref<16x4xf32, #tpu.memory_space<vmem>>, vector<16x1xf32>
    tpu.vector_store %arg11[%c0_39, %c1_40], %55 {strides = array<i32>} : memref<16x4xf32, #tpu.memory_space<vmem>>, vector<16x1xf32>,
    %c0_41 = arith.constant 0 : index
    %c16 = arith.constant 16 : index
    %79 = vector.load %arg10[%c0_41, %c16] : memref<16x32xf32, #tpu.memory_space<vmem>>, vector<16x8xf32>
    %80 = vector.extract_strided_slice %3 {offsets = [0, 16], sizes = [8, 8], strides = [1, 1]} : vector<8x32xf32> to vector<8x8xf32>
    %cst_42 = arith.constant dense<0.000000e+00> : vector<16x8xf32>
    %81 = tpu.matmul %79, %80, %cst_42 {dimension_numbers = #tpu.dot_dimension_numbers<[1], [1], [0], [0], [0, 0, 1, 0], [], []>} : vector<16x8xf32>, vector<8x8xf32>, vector<16x8xf32> -> vector<16x8xf32>
    %cst_43 = arith.constant -1.000000e+30 : f32
    %82 = vector.shape_cast %10 : vector<1x8xi1> to vector<1x8xi1>
    %83 = vector.broadcast %82 : vector<1x8xi1> to vector<16x8xi1>
    %84 = vector.broadcast %cst_43 : f32 to vector<16x8xf32>
    %85 = arith.select %83, %81, %84 : vector<16x8xi1>, vector<16x8xf32>
    %c0_44 = arith.constant 0 : index
    %c2 = arith.constant 2 : index
    %86 = vector.load %arg11[%c0_44, %c2] : memref<16x4xf32, #tpu.memory_space<vmem>>, vector<16x1xf32>
    %cst_45 = arith.constant dense<0xFF800000> : vector<16xf32>
    %87 = vector.multi_reduction <maximumf>, %85, %cst_45 [1] : vector<16x8xf32> to vector<16xf32>
    %88 = vector.shape_cast %87 : vector<16xf32> to vector<16x1xf32>
    %89 = arith.maximumf %86, %88 : vector<16x1xf32>
    %90 = arith.subf %86, %89 : vector<16x1xf32>
    %91 = math.exp %90 : vector<16x1xf32>
    %92 = vector.broadcast %89 : vector<16x1xf32> to vector<16x8xf32>
    %93 = arith.subf %85, %92 : vector<16x8xf32>
    %94 = math.exp %93 : vector<16x8xf32>
    %cst_46 = arith.constant 0.000000e+00 : f32
    %95 = vector.shape_cast %10 : vector<1x8xi1> to vector<1x8xi1>
    %96 = vector.broadcast %95 : vector<1x8xi1> to vector<16x8xi1>
    %97 = vector.broadcast %cst_46 : f32 to vector<16x8xf32>
    %98 = arith.select %96, %94, %97 : vector<16x8xi1>, vector<16x8xf32>
    %c0_47 = arith.constant 0 : index
    %c2_48 = arith.constant 2 : index
    %99 = vector.load %arg12[%c0_47, %c2_48] : memref<16x4xf32, #tpu.memory_space<vmem>>, vector<16x1xf32>
    %100 = arith.mulf %91, %99 : vector<16x1xf32>
    %cst_49 = arith.constant dense<0.000000e+00> : vector<16xf32>
    %101 = vector.multi_reduction <add>, %98, %cst_49 [1] : vector<16x8xf32> to vector<16xf32>
    %102 = vector.shape_cast %101 : vector<16xf32> to vector<16x1xf32>
    %103 = arith.addf %100, %102 : vector<16x1xf32>
    %c0_50 = arith.constant 0 : index
    %c2_51 = arith.constant 2 : index
    %104 = vector.load %arg12[%c0_50, %c2_51] : memref<16x4xf32, #tpu.memory_space<vmem>>, vector<16x1xf32>
    tpu.vector_store %arg12[%c0_50, %c2_51], %103 {strides = array<i32>} : memref<16x4xf32, #tpu.memory_space<vmem>>, vector<16x1xf32>,
    %c0_52 = arith.constant 0 : index
    %c16_53 = arith.constant 16 : index
    %105 = vector.load %arg13[%c0_52, %c16_53] : memref<16x32xf32, #tpu.memory_space<vmem>>, vector<16x8xf32>
    %106 = vector.broadcast %91 : vector<16x1xf32> to vector<16x8xf32>
    %107 = arith.mulf %106, %105 : vector<16x8xf32>
    %108 = vector.extract_strided_slice %4 {offsets = [0, 16], sizes = [8, 8], strides = [1, 1]} : vector<8x32xf32> to vector<8x8xf32>
    %cst_54 = arith.constant dense<0.000000e+00> : vector<16x8xf32>
    %109 = tpu.matmul %98, %108, %cst_54 {dimension_numbers = #tpu.dot_dimension_numbers<[1], [0], [0], [1], [0, 0, 1, 1], [], []>} : vector<16x8xf32>, vector<8x8xf32>, vector<16x8xf32> -> vector<16x8xf32>
    %110 = arith.addf %107, %109 : vector<16x8xf32>
    %c0_55 = arith.constant 0 : index
    %c16_56 = arith.constant 16 : index
    %111 = vector.load %arg13[%c0_55, %c16_56] : memref<16x32xf32, #tpu.memory_space<vmem>>, vector<16x8xf32>
    tpu.vector_store %arg13[%c0_55, %c16_56], %110 {strides = array<i32>} : memref<16x32xf32, #tpu.memory_space<vmem>>, vector<16x8xf32>,
    %c0_57 = arith.constant 0 : index
    %c2_58 = arith.constant 2 : index
    %112 = vector.load %arg11[%c0_57, %c2_58] : memref<16x4xf32, #tpu.memory_space<vmem>>, vector<16x1xf32>
    tpu.vector_store %arg11[%c0_57, %c2_58], %89 {strides = array<i32>} : memref<16x4xf32, #tpu.memory_space<vmem>>, vector<16x1xf32>,
    %c0_59 = arith.constant 0 : index
    %c24 = arith.constant 24 : index
    %113 = vector.load %arg10[%c0_59, %c24] : memref<16x32xf32, #tpu.memory_space<vmem>>, vector<16x8xf32>
    %114 = vector.extract_strided_slice %3 {offsets = [0, 24], sizes = [8, 8], strides = [1, 1]} : vector<8x32xf32> to vector<8x8xf32>
    %cst_60 = arith.constant dense<0.000000e+00> : vector<16x8xf32>
    %115 = tpu.matmul %113, %114, %cst_60 {dimension_numbers = #tpu.dot_dimension_numbers<[1], [1], [0], [0], [0, 0, 1, 0], [], []>} : vector<16x8xf32>, vector<8x8xf32>, vector<16x8xf32> -> vector<16x8xf32>
    %cst_61 = arith.constant -1.000000e+30 : f32
    %116 = vector.shape_cast %10 : vector<1x8xi1> to vector<1x8xi1>
    %117 = vector.broadcast %116 : vector<1x8xi1> to vector<16x8xi1>
    %118 = vector.broadcast %cst_61 : f32 to vector<16x8xf32>
    %119 = arith.select %117, %115, %118 : vector<16x8xi1>, vector<16x8xf32>
    %c0_62 = arith.constant 0 : index
    %c3 = arith.constant 3 : index
    %120 = vector.load %arg11[%c0_62, %c3] : memref<16x4xf32, #tpu.memory_space<vmem>>, vector<16x1xf32>
    %cst_63 = arith.constant dense<0xFF800000> : vector<16xf32>
    %121 = vector.multi_reduction <maximumf>, %119, %cst_63 [1] : vector<16x8xf32> to vector<16xf32>
    %122 = vector.shape_cast %121 : vector<16xf32> to vector<16x1xf32>
    %123 = arith.maximumf %120, %122 : vector<16x1xf32>
    %124 = arith.subf %120, %123 : vector<16x1xf32>
    %125 = math.exp %124 : vector<16x1xf32>
    %126 = vector.broadcast %123 : vector<16x1xf32> to vector<16x8xf32>
    %127 = arith.subf %119, %126 : vector<16x8xf32>
    %128 = math.exp %127 : vector<16x8xf32>
    %cst_64 = arith.constant 0.000000e+00 : f32
    %129 = vector.shape_cast %10 : vector<1x8xi1> to vector<1x8xi1>
    %130 = vector.broadcast %129 : vector<1x8xi1> to vector<16x8xi1>
    %131 = vector.broadcast %cst_64 : f32 to vector<16x8xf32>
    %132 = arith.select %130, %128, %131 : vector<16x8xi1>, vector<16x8xf32>
    %c0_65 = arith.constant 0 : index
    %c3_66 = arith.constant 3 : index
    %133 = vector.load %arg12[%c0_65, %c3_66] : memref<16x4xf32, #tpu.memory_space<vmem>>, vector<16x1xf32>
    %134 = arith.mulf %125, %133 : vector<16x1xf32>
    %cst_67 = arith.constant dense<0.000000e+00> : vector<16xf32>
    %135 = vector.multi_reduction <add>, %132, %cst_67 [1] : vector<16x8xf32> to vector<16xf32>
    %136 = vector.shape_cast %135 : vector<16xf32> to vector<16x1xf32>
    %137 = arith.addf %134, %136 : vector<16x1xf32>
    %c0_68 = arith.constant 0 : index
    %c3_69 = arith.constant 3 : index
    %138 = vector.load %arg12[%c0_68, %c3_69] : memref<16x4xf32, #tpu.memory_space<vmem>>, vector<16x1xf32>
    tpu.vector_store %arg12[%c0_68, %c3_69], %137 {strides = array<i32>} : memref<16x4xf32, #tpu.memory_space<vmem>>, vector<16x1xf32>,
    %c0_70 = arith.constant 0 : index
    %c24_71 = arith.constant 24 : index
    %139 = vector.load %arg13[%c0_70, %c24_71] : memref<16x32xf32, #tpu.memory_space<vmem>>, vector<16x8xf32>
    %140 = vector.broadcast %125 : vector<16x1xf32> to vector<16x8xf32>
    %141 = arith.mulf %140, %139 : vector<16x8xf32>
    %142 = vector.extract_strided_slice %4 {offsets = [0, 24], sizes = [8, 8], strides = [1, 1]} : vector<8x32xf32> to vector<8x8xf32>
    %cst_72 = arith.constant dense<0.000000e+00> : vector<16x8xf32>
    %143 = tpu.matmul %132, %142, %cst_72 {dimension_numbers = #tpu.dot_dimension_numbers<[1], [0], [0], [1], [0, 0, 1, 1], [], []>} : vector<16x8xf32>, vector<8x8xf32>, vector<16x8xf32> -> vector<16x8xf32>
    %144 = arith.addf %141, %143 : vector<16x8xf32>
    %c0_73 = arith.constant 0 : index
    %c24_74 = arith.constant 24 : index
    %145 = vector.load %arg13[%c0_73, %c24_74] : memref<16x32xf32, #tpu.memory_space<vmem>>, vector<16x8xf32>
    tpu.vector_store %arg13[%c0_73, %c24_74], %144 {strides = array<i32>} : memref<16x32xf32, #tpu.memory_space<vmem>>, vector<16x8xf32>,
    %c0_75 = arith.constant 0 : index
    %c3_76 = arith.constant 3 : index
    %146 = vector.load %arg11[%c0_75, %c3_76] : memref<16x4xf32, #tpu.memory_space<vmem>>, vector<16x1xf32>
    tpu.vector_store %arg11[%c0_75, %c3_76], %123 {strides = array<i32>} : memref<16x4xf32, #tpu.memory_space<vmem>>, vector<16x1xf32>,
    %c1_i32 = arith.constant 1 : i32
    %147 = arith.cmpi eq, %arg1, %c1_i32 : i32
    %148 = arith.extui %147 : i1 to i32
    %c0_i32_77 = arith.constant 0 : i32
    %149 = arith.cmpi ne, %148, %c0_i32_77 : i32
    scf.if %149 {
      %c0_78 = arith.constant 0 : index
      %c0_79 = arith.constant 0 : index
      %150 = vector.load %arg13[%c0_78, %c0_79] : memref<16x32xf32, #tpu.memory_space<vmem>>, vector<16x8xf32>
      %c0_80 = arith.constant 0 : index
      %c0_81 = arith.constant 0 : index
      %151 = vector.load %arg12[%c0_80, %c0_81] : memref<16x4xf32, #tpu.memory_space<vmem>>, vector<16x1xf32>
      %152 = tpu.reciprocal %151 : vector<16x1xf32> -> vector<16x1xf32>
      %153 = vector.broadcast %152 : vector<16x1xf32> to vector<16x8xf32>
      %154 = arith.mulf %150, %153 : vector<16x8xf32>
      %c0_82 = arith.constant 0 : index
      %c0_83 = arith.constant 0 : index
      %155 = vector.load %arg13[%c0_82, %c0_83] : memref<16x32xf32, #tpu.memory_space<vmem>>, vector<16x8xf32>
      tpu.vector_store %arg13[%c0_82, %c0_83], %154 {strides = array<i32>} : memref<16x32xf32, #tpu.memory_space<vmem>>, vector<16x8xf32>,
      %c0_84 = arith.constant 0 : index
      %c8_85 = arith.constant 8 : index
      %156 = vector.load %arg13[%c0_84, %c8_85] : memref<16x32xf32, #tpu.memory_space<vmem>>, vector<16x8xf32>
      %c0_86 = arith.constant 0 : index
      %c1_87 = arith.constant 1 : index
      %157 = vector.load %arg12[%c0_86, %c1_87] : memref<16x4xf32, #tpu.memory_space<vmem>>, vector<16x1xf32>
      %158 = tpu.reciprocal %157 : vector<16x1xf32> -> vector<16x1xf32>
      %159 = vector.broadcast %158 : vector<16x1xf32> to vector<16x8xf32>
      %160 = arith.mulf %156, %159 : vector<16x8xf32>
      %c0_88 = arith.constant 0 : index
      %c8_89 = arith.constant 8 : index
      %161 = vector.load %arg13[%c0_88, %c8_89] : memref<16x32xf32, #tpu.memory_space<vmem>>, vector<16x8xf32>
      tpu.vector_store %arg13[%c0_88, %c8_89], %160 {strides = array<i32>} : memref<16x32xf32, #tpu.memory_space<vmem>>, vector<16x8xf32>,
      %c0_90 = arith.constant 0 : index
      %c16_91 = arith.constant 16 : index
      %162 = vector.load %arg13[%c0_90, %c16_91] : memref<16x32xf32, #tpu.memory_space<vmem>>, vector<16x8xf32>
      %c0_92 = arith.constant 0 : index
      %c2_93 = arith.constant 2 : index
      %163 = vector.load %arg12[%c0_92, %c2_93] : memref<16x4xf32, #tpu.memory_space<vmem>>, vector<16x1xf32>
      %164 = tpu.reciprocal %163 : vector<16x1xf32> -> vector<16x1xf32>
      %165 = vector.broadcast %164 : vector<16x1xf32> to vector<16x8xf32>
      %166 = arith.mulf %162, %165 : vector<16x8xf32>
      %c0_94 = arith.constant 0 : index
      %c16_95 = arith.constant 16 : index
      %167 = vector.load %arg13[%c0_94, %c16_95] : memref<16x32xf32, #tpu.memory_space<vmem>>, vector<16x8xf32>
      tpu.vector_store %arg13[%c0_94, %c16_95], %166 {strides = array<i32>} : memref<16x32xf32, #tpu.memory_space<vmem>>, vector<16x8xf32>,
      %c0_96 = arith.constant 0 : index
      %c24_97 = arith.constant 24 : index
      %168 = vector.load %arg13[%c0_96, %c24_97] : memref<16x32xf32, #tpu.memory_space<vmem>>, vector<16x8xf32>
      %c0_98 = arith.constant 0 : index
      %c3_99 = arith.constant 3 : index
      %169 = vector.load %arg12[%c0_98, %c3_99] : memref<16x4xf32, #tpu.memory_space<vmem>>, vector<16x1xf32>
      %170 = tpu.reciprocal %169 : vector<16x1xf32> -> vector<16x1xf32>
      %171 = vector.broadcast %170 : vector<16x1xf32> to vector<16x8xf32>
      %172 = arith.mulf %168, %171 : vector<16x8xf32>
      %c0_100 = arith.constant 0 : index
      %c24_101 = arith.constant 24 : index
      %173 = vector.load %arg13[%c0_100, %c24_101] : memref<16x32xf32, #tpu.memory_space<vmem>>, vector<16x8xf32>
      tpu.vector_store %arg13[%c0_100, %c24_101], %172 {strides = array<i32>} : memref<16x32xf32, #tpu.memory_space<vmem>>, vector<16x8xf32>,
      %c0_102 = arith.constant 0 : index
      %c0_103 = arith.constant 0 : index
      %174 = vector.load %arg13[%c0_102, %c0_103] : memref<16x32xf32, #tpu.memory_space<vmem>>, vector<16x32xf32>
      %c0_104 = arith.constant 0 : index
      %c0_105 = arith.constant 0 : index
      %175 = vector.load %arg6[%c0_104, %c0_105] : memref<32x32xf32, #tpu.memory_space<vmem>>, vector<32x32xf32>
      %cst_106 = arith.constant dense<0.000000e+00> : vector<16x32xf32>
      %176 = tpu.matmul %174, %175, %cst_106 {dimension_numbers = #tpu.dot_dimension_numbers<[1], [0], [0], [1], [0, 0, 1, 1], [], []>} : vector<16x32xf32>, vector<32x32xf32>, vector<16x32xf32> -> vector<16x32xf32>
      %c0_107 = arith.constant 0 : index
      %c0_108 = arith.constant 0 : index
      %177 = vector.load %arg8[%c0_107, %c0_108] : memref<1x32xf32, #tpu.memory_space<vmem>>, vector<1x32xf32>
      %178 = vector.broadcast %177 : vector<1x32xf32> to vector<16x32xf32>
      %179 = arith.addf %176, %178 : vector<16x32xf32>
      %c0_109 = arith.constant 0 : index
      %c0_110 = arith.constant 0 : index
      %180 = vector.load %arg9[%c0_109, %c0_110] : memref<16x32xf32, #tpu.memory_space<vmem>>, vector<16x32xf32>
      tpu.vector_store %arg9[%c0_109, %c0_110], %179 {strides = array<i32>} : memref<16x32xf32, #tpu.memory_space<vmem>>, vector<16x32xf32>,
    } else {
    }
    return
  }
  func.func @transform_0(%arg0: i32, %arg1: i32) -> (i32, i32) {
    %c0_i32 = arith.constant 0 : i32
    %c0_i32_0 = arith.constant 0 : i32
    return %arg0, %c0_i32 : i32, i32
  }
  func.func @transform_1(%arg0: i32, %arg1: i32) -> (i32, i32) {
    %c0_i32 = arith.constant 0 : i32
    %c0_i32_0 = arith.constant 0 : i32
    return %arg1, %c0_i32 : i32, i32
  }
  func.func @transform_2(%arg0: i32, %arg1: i32) -> (i32, i32) {
    %c0_i32 = arith.constant 0 : i32
    %c0_i32_0 = arith.constant 0 : i32
    return %arg1, %c0_i32 : i32, i32
  }
  func.func @transform_3(%arg0: i32, %arg1: i32) -> (i32, i32) {
    %c0_i32 = arith.constant 0 : i32
    %c0_i32_0 = arith.constant 0 : i32
    %c0_i32_1 = arith.constant 0 : i32
    return %c0_i32, %c0_i32_0 : i32, i32
  }
  func.func @transform_4(%arg0: i32, %arg1: i32) -> (i32, i32) {
    %c0_i32 = arith.constant 0 : i32
    %c0_i32_0 = arith.constant 0 : i32
    %c0_i32_1 = arith.constant 0 : i32
    return %c0_i32, %c0_i32_0 : i32, i32
  }
  func.func @transform_5(%arg0: i32, %arg1: i32) -> (i32, i32) {
    %c0_i32 = arith.constant 0 : i32
    %c0_i32_0 = arith.constant 0 : i32
    %c0_i32_1 = arith.constant 0 : i32
    return %c0_i32, %c0_i32_0 : i32, i32
  }
  func.func @transform_6(%arg0: i32, %arg1: i32) -> (i32, i32) {
    %c0_i32 = arith.constant 0 : i32
    %c0_i32_0 = arith.constant 0 : i32
    %c0_i32_1 = arith.constant 0 : i32
    return %c0_i32, %c0_i32_0 : i32, i32
  }
  func.func @transform_7(%arg0: i32, %arg1: i32) -> (i32, i32) {
    %c0_i32 = arith.constant 0 : i32
    %c0_i32_0 = arith.constant 0 : i32
    return %arg0, %c0_i32 : i32, i32
  }
}

</mosaic_0001>

<bundles_post_ra>
// kernel: tpu_custom_call.1
= control target key start
LH: loop header
LB: loop body
LE: loop exit
PB: predicated region body
PF: predicated region fallthrough
CT: control target
= control target key end

     0   :  { %s2703_s0 = inlined_call_operand.hbm [shape: f32[32,32], index: 0, kind: input, shape index: {}]   ;;  %s2704_s1 = inlined_call_operand.hbm [shape: f32[16,32], index: 1, kind: input, shape index: {}]   ;;  %s2705_s2 = inlined_call_operand.hbm [shape: f32[16,32], index: 2, kind: input, shape index: {}]   ;;  %s2706_s3 = inlined_call_operand.hbm [shape: f32[32,32], index: 3, kind: input, shape index: {}]   ;;  %s2707_s4 = inlined_call_operand.hbm [shape: f32[32,32], index: 4, kind: input, shape index: {}]   ;;  %s2708_s5 = inlined_call_operand.vmem [shape: f32[1,32], index: 5, kind: input, shape index: {}]   ;;  %s2709_s6 = inlined_call_operand.vmem [shape: f32[1,32], index: 6, kind: input, shape index: {}]   ;;  %s2710_s7 = inlined_call_operand.hbm [shape: f32[32,32], index: 7, kind: output, shape index: {}]  }
   0x1   :  { %2731 = sst [smem:[#allocation30_spill]] %s2704_s1 }
   0x2   :  { %2732 = sst [smem:[#allocation31_spill]] %s2705_s2 }
   0x3   :  { %2733 = sst [smem:[#allocation32_spill]] %s2706_s3 }
   0x4   :  { %2734 = sst [smem:[#allocation33_spill]] %s2707_s4 }
   0x5   :  { %2735 = sst [smem:[#allocation34_spill]] %s2708_s5 }
   0x6   :  { %2736 = sst [smem:[#allocation35_spill]] %s2709_s6 }
   0x7   :  { %2737 = sst [smem:[#allocation36_spill]] %s2710_s7 }
   0x8   :  { %12 = vsyncpa [#allocation7], 0 }
   0x9   :  { %14 = vsyncpa [#allocation7 + $0x1], 0 }
   0xa   :  { %15 = vsyncpa [#allocation10], 0 }
   0xb   :  { %17 = vsyncpa [#allocation10 + $0x1], 0 }
   0xc   :  { %18 = vsyncpa [#allocation13], 0 }
   0xd   :  { %19 = vsyncpa [#allocation8], 0 }
   0xe   :  { %21 = vsyncpa [#allocation8 + $0x1], 0  ;;  %s2098_s24 = smov 0   ;;  %s2100_s25 = smov 0  }
   0xf   :  { %s2102_s26 = smov 0   ;;  %s2104_s27 = smov 0  }
  0x10   :  { %s2106_s28 = smov 0   ;;  %s2108_s29 = smov 0  }
  0x11   :  { %s2110_s30 = smov 0   ;;  %s2112_s8 = smov 0  }
  0x12   :  { %s2114_s9 = smov 0   ;;  %s2116_s10 = smov 0  }
  0x13   :  { %s2118_s11 = smov 0  }
  0x14 LB: > { %2738 = sst [smem:[#allocation20_spill]] %s2003_s26  ;;  %s2154_s12 = sadd.s32 4294967295, %s2035_s11   ;;  %s2035_s11 = sphi %s2118_s11, %s27_s11   ;;  %s2031_s10 = sphi %s2116_s10, %s2792_s10   ;;  %s2027_s9 = sphi %s2114_s9, %s2784_s9   ;;  %s2023_s8 = sphi %s2112_s8, %s2791_s8   ;;  %s2019_s30 = sphi %s2110_s30, %s2783_s30   ;;  %s2015_s29 = sphi %s2108_s29, %s2790_s29   ;;  %s2011_s28 = sphi %s2106_s28, %s2789_s28   ;;  %s2007_s27 = sphi %s2104_s27, %s2788_s27   ;;  %s2003_s26 = sphi %s2102_s26, %s2782_s26   ;;  %s1999_s25 = sphi %s2100_s25, %s2787_s25   ;;  %s1995_s24 = sphi %s2098_s24, %s2786_s24  }
  0x15   : > { %2739 = sst [smem:[#allocation21_spill]] %s2007_s27  ;;  %p1481_p0 = scmp.ge.s32.totalorder %s2035_s11, 1 }
  0x16   : > { %2740 = sst [smem:[#allocation22_spill]] %s2019_s30  ;;  %p60_p1 = scmp.eq.s32.totalorder %s2154_s12, 0 }
  0x17   : > { %2741 = sst [smem:[#allocation23_spill]] %s2023_s8  ;;  %p232_p2 = scmp.lt.s32.totalorder %s2035_s11, 5 }
  0x18   : > { %2742 = sst [smem:[#allocation24_spill]] %s2027_s9  ;;  %s2037_s17 = smov [#allocation12]  }
  0x19   : > { %2743 = sst [smem:[#allocation25_spill]] %s2035_s11  ;;  %p2162_p3 = pnand %p1481_p0, %p232_p2 }
  0x1a   : > { %s2744_s3 = sld [smem:[#allocation32_spill]]  ;;  %s245_s18 = sshll.u32 %s2037_s17, 4  ;;  %s246_s18 = int_to_ptr.vmem [resolvable:$true] %s245_s18 }
  0x1b   : > { %s2745_s16 = scalar_select %p2162_p3, 1, 0 }
  0x1c   : > { %p1561_p4 = pneg %p2162_p3  ;;  %s2711_s20 = smov 128  }
  0x1d   : > { %s2713_s21 = smov 8   ;;  %s1480_s22 = sadd.s32 4294967294, %s2035_s11  }
  0x1e   : > { %p2170_p5 = pnand %p1561_p4, %p60_p1  ;;  %s36_s23 = sadd.s32 1, %s2027_s9 }
  0x1f   : > { %p2182_p6 = scmp.ge.s32.totalorder %s36_s23, 2  ;;  %p2715_p7 = scmp.ne.s32.totalorder %s2015_s29, %s2011_s28 }
  0x20   : > { %s243_s15 = sshll.u32 %s2744_s3, 4  ;;  %p54_p8 = scmp.eq.s32.totalorder %s2035_s11, 0  ;;  %s244_s15 = int_to_ptr.hbm [resolvable:$true] %s243_s15 }
  0x21   : > { %1564 = dma.hbm_to_vmem [thread:$0]  (!%p2170_p5), %s244_s15, 512, %s246_s18, [#allocation13], %s2711_s20, %s2711_s20, %s2713_s21  }
  0x22   : > { %s2747_s14 = scalar_select %p2182_p6, 1, 0 }
  0x23   : > { %p2716_p9 = scmp.ne.s32.totalorder %s2011_s28, %s2007_s27  ;;  %s2794_s23 = smov (%p2182_p6, %s36_s23), 0 }
  0x24   : > { %2748 = sst [smem:[#allocation26_spill]] %s2794_s23  ;;  %p2198_p10 = por %p54_p8, %p2715_p7 }
  0x25   : > { %p2207_p11 = por %p60_p1, %p2716_p9  ;;  %s69_s18 = ssub.s32 %s2027_s9, %s2794_s23 }
  0x26   : > { %s72_s13 = sadd.s32 1, %s2003_s26  ;;  %p70_p12 = scmp.eq.s32.totalorder %s69_s18, 0 }
  0x27   : > { %s2750_s17 = scalar_select %p2207_p11, 1, 0 }
  0x28   : > { %p79_p13 = scmp.ne.s32.totalorder %s2003_s26, %s1999_s25  ;;  %p85_p0 = scmp.ne.s32.totalorder %s1999_s25, %s1995_s24 }
  0x29   : > { %p219_p2 = scmp.eq.s32.totalorder %s2154_s12, 3  ;;  %p2754_p9 = scmp.ne.s32.totalorder %s2015_s29, %s2011_s28 }
  0x2a   : > { %s2220_s20 = scalar_select %p70_p12, %s2003_s26, %s72_s13  }
  0x2b   : > { %p2222_p4 = por %p79_p13, %p54_p8  ;;  %p2228_p7 = por %p85_p0, %p60_p1 }
  0x2c   : > { %2751 = sst [smem:[#allocation27_spill]] %s2220_s20  ;;  %p2235_p11 = por %p219_p2, %p2754_p9 }
  0x2d   : > { %p225_p3 = scmp.eq.s32.totalorder %s1480_s22, 3  ;;  %p1584_p6 = scmp.lt.s32.totalorder %s2035_s11, 4 }
  0x2e   : > { %s2755_s23 = scalar_select %p2235_p11, 1, 0 }
  0x2f   : > { %s301_s24 = sand.u32 1, %s2035_s11   ;;  %p2757_p12 = scmp.ne.s32.totalorder %s2011_s28, %s2007_s27 }
  0x30   : > { %2756 = sst [smem:[#allocation28_spill]] %s2755_s23  ;;  %p2252_p13 = pnand %p1584_p6, %p2198_p10 }
  0x31   : > { %p2244_p8 = por %p225_p3, %p2757_p12  ;;  %s303_s20 = sand.u32 1, %s2003_s26  }
  0x32   : > { %s2257_s7 = sshll.u32 %s303_s20, 3  ;;  %s1489_s8 = sshll.u32 %s2027_s9, 3 }
  0x33   : > { %s2758_s13 = scalar_select %p2244_p8, 1, 0 }
  0x34   : > { %s2761_s1 = sld [smem:[#allocation30_spill]]  ;;  %s305_s6 = scalar_lea.vmem [#allocation9], %s2257_s7 }
  0x35   : > { %2759 = sst [smem:[#allocation29_spill]] %s2758_s13  ;;  %s313_s13 = sshll.u32 %s305_s6, 4  ;;  %s314_s13 = int_to_ptr.vmem [resolvable:$true] %s313_s13 }
  0x36   : > { %p2268_p3 = pnand %p1584_p6, %p2222_p4  ;;  %s2763_s2 = sld [smem:[#allocation31_spill]] }
  0x37   : > { %s2764_s4 = sld [smem:[#allocation33_spill]]  ;;  %s2040_s21 = smov [#allocation14]  }
  0x38   : > { %s259_s11 = sshll.u32 %s2040_s21, 4  ;;  %s2765_s5 = smov 8   ;;  %s260_s11 = int_to_ptr.vmem [resolvable:$true] %s259_s11 }
  0x39   : > { %s2766_s9 = smov 128   ;;  %s279_s23 = sand.u32 1, %s2015_s29  }
  0x3a   : > { %s309_s27 = scalar_lea.hbm %s2761_s1, %s1489_s8  ;;  %p2767_p6 = scmp.ne.s32.totalorder %s2747_s14, 0 }
  0x3b   : > { %s311_s15 = sshll.u32 %s309_s27, 4  ;;  %s2280_s27 = scalar_lea.sflag [#allocation10], %s301_s24  ;;  %s312_s15 = int_to_ptr.hbm [resolvable:$true] %s311_s15 }
  0x3c   : > { %s2275_s22 = scalar_lea.hbm %s2763_s2, %s1489_s8  ;;  %s39_s8 = sadd.s32 1, %s2031_s10 }
  0x3d   : > { %s257_s26 = sshll.u32 %s2764_s4, 4  ;;  %s2796_s8 = smov (!%p2767_p6, %s39_s8), %s2031_s10  ;;  %s258_s26 = int_to_ptr.hbm [resolvable:$true] %s257_s26 }
  0x3e   : > { %1574 = dma.hbm_to_vmem [thread:$0]  (!%p2268_p3), %s312_s15, 128, %s314_s13, %s2280_s27  }
  0x3f   : > { %1567 = dma.hbm_to_vmem [thread:$0]  (!%p2170_p5), %s258_s26, 512, %s260_s11, [#allocation13], %s2766_s9, %s2766_s9, %s2765_s5  }
  0x40   : > { %s1485_s1 = sshll.u32 %s279_s23, 4  ;;  %p41_p9 = scmp.ge.s32.totalorder %s2796_s8, 2 }
  0x41   : > { %s1535_s24 = sshll.u32 %s2031_s10, 4  ;;  %s283_s13 = scalar_lea.vmem [#allocation6], %s1485_s1 }
  0x42   : > { %s291_s15 = sshll.u32 %s283_s13, 4  ;;  %s2798_s8 = smov (%p41_p9, %s2796_s8), 0  ;;  %s292_s15 = int_to_ptr.vmem [resolvable:$true] %s291_s15 }
  0x43   : > { %s288_s11 = scalar_lea.hbm %s2703_s0, %s1535_s24  ;;  %s43_s14 = ssub.s32 %s2031_s10, %s2798_s8 }
  0x44   : > { %s289_s6 = sshll.u32 %s288_s11, 4  ;;  %p44_p5 = scmp.eq.s32.totalorder %s43_s14, 0  ;;  %s290_s6 = int_to_ptr.hbm [resolvable:$true] %s289_s6 }
  0x45   : > { %s280_s21 = scalar_lea.sflag [#allocation7], %s279_s23  ;;  %s2768_s1 = sadd.s32 1, %s2015_s29 }
  0x46   : > { %1571 = dma.hbm_to_vmem [thread:$0]  (!%p2252_p13), %s290_s6, 256, %s292_s15, %s280_s21, %s2766_s9, %s2766_s9, %s2765_s5  }
  0x47   : > { %s2311_s13 = scalar_select %p44_p5, %s2015_s29, %s2768_s1  }
  0x48   : > { %s330_s2 = sshll.u32 %s2275_s22, 4  ;;  %s324_s4 = scalar_lea.vmem [#allocation11], %s2257_s7  ;;  %s331_s2 = int_to_ptr.hbm [resolvable:$true] %s330_s2 }
  0x49   : > { %s332_s30 = sshll.u32 %s324_s4, 4  ;;  %p2769_p10 = scmp.ne.s32.totalorder %s2745_s16, 0  ;;  %s333_s30 = int_to_ptr.vmem [resolvable:$true] %s332_s30 }
  0x4a   : > { %1577 = dma.hbm_to_vmem [thread:$0]  (!%p2268_p3), %s331_s2, 128, %s333_s30, %s2280_s27  }
  0x4b   : > { %341 = sbr.rel (%p2769_p10) target bundleno = 1796 (0x704), region = 48  ;;  %s2321_s18 = sand.u32 (!%p2769_p10), 1, %s2011_s28  }
  0x4c   : > { %s1493_s5 = sshll.u32 (!%p2769_p10), %s2321_s18, 4  ;;  %s344_s9 = scalar_lea.sflag (!%p2769_p10), [#allocation7], %s2321_s18 }
  0x4d   : > { %s2325_s23 = scalar_lea.vmem (!%p2769_p10), [#allocation6], %s1493_s5  ;;  %p2770_p0 = scmp.ne.s32.totalorder (!%p2769_p10), %s2750_s17, 0 }
  0x50   : > { %1978 = dma.done.wait (%p2770_p0), %s344_s9, 256  }
  0x51   : > { %1980 = vsyncadd (%p2770_p0), %s344_s9, 4294967040  ;;  %s353_s2 = sand.u32 1, %s2154_s12   ;;  %s355_s4 = sand.u32 1, %s1999_s25  }
  0x52   : > { %s2333_s7 = sshll.u32 %s355_s4, 3  ;;  %s354_s30 = scalar_lea.sflag [#allocation10], %s353_s2 }
  0x53   : > { %s357_s16 = scalar_lea.vmem [#allocation9], %s2333_s7 }
  0x54   : > { %1982 = dma.done.wait (%p2228_p7), %s354_s30, 256  }
  0x55   : > { %1984 = vsyncadd (%p2228_p7), %s354_s30, 4294967040  ;;  %s367_s20 = scalar_lea.vmem [#allocation11], %s2333_s7 }
  0x56   : > { %1986 = dma.done.wait (%p60_p1), [#allocation13], 1024  }
  0x57   : > { %1988 = vsyncadd (%p60_p1), [#allocation13], 4294966272  ;;  %s2345_s17 = scalar_lea.vmem [#allocation15], %s1493_s5  ;;  %s2771_s22 = sld [smem:[#allocation22_spill]] }
  0x5d   : > { %p1499_p2 = scmp.ne.s32.totalorder %s2771_s22, 0 }
  0x5e   : > { %s2772_s27 = sld [smem:[#allocation34_spill]] (!%p1499_p2) }
  0x5f   : > { %424 = sbr.rel (%p1499_p2) target bundleno = 248 (0xf8), region = 72 }
  0x64   : > { %v430_v0 = vld [vmem:[#allocation12 + $0x18] sm:$0xff]  ;;  %vm435_vm0 = vcmask 261120   ;;  %vm481_vm1 = vcmask 31744   ;;  %v2041_v1 = vmov -1e+30   ;;  %v429_v2 = vld [vmem:[#allocation12 + $0x10] sm:$0xff] }
  0x65   : > { %1500 = vmatpush.xpose.msk.msra.mxu0 %vm435_vm0, %v430_v0  ;;  %482 = vst.msk [vmem:[#allocation3] sm:$0xff] %vm481_vm1, %v2041_v1  ;;  %1537 = vmatpush.xpose.msk.msra.mxu1 %vm435_vm0, %v430_v0  ;;  %v2042_v3 = vmov 0.0   ;;  %v428_v4 = vld [vmem:[#allocation12 + $0x8] sm:$0xff]  ;;  %v427_v5 = vld [vmem:[#allocation12] sm:$0xff] }
  0x66   : > { %483 = vst.msk [vmem:[#allocation3 + $0x8] sm:$0xff] %vm481_vm1, %v2041_v1  ;;  %v425_v6 = vld [vmem:[%s2325_s23] sm:$0xff]  ;;  %v426_v7 = vld [vmem:[%s2325_s23 + $0x8] sm:$0xff] }
  0x67   : > { %484 = vst.msk [vmem:[#allocation4] sm:$0xff] %vm481_vm1, %v2042_v3  ;;  %v1697_v8 = vld [vmem:[%s2772_s27] ss:$0 sm:$0xff] }
  0x68   : > { %485 = vst.msk [vmem:[#allocation4 + $0x8] sm:$0xff] %vm481_vm1, %v2042_v3 }
  0x69   : > { %486 = vst.msk [vmem:[#allocation5] sm:$0xff] %vm435_vm0, %v2042_v3  ;;  %1501 = vmatpush.xpose.msk.msra.mxu0 %vm435_vm0, %v429_v2  ;;  %1538 = vmatpush.xpose.msk.msra.mxu1 %vm435_vm0, %v429_v2 }
  0x6a   : > { %487 = vst.msk [vmem:[#allocation5 + $0x8] sm:$0xff] %vm435_vm0, %v2042_v3 }
  0x6d   : > { %1502 = vmatpush.xpose.msk.msra.mxu0 %vm435_vm0, %v428_v4  ;;  %1539 = vmatpush.xpose.msk.msra.mxu1 %vm435_vm0, %v428_v4 }
  0x71   : > { %1503 = vmatpush.xpose.msk.msra.mxu0 %vm435_vm0, %v427_v5  ;;  %1540 = vmatpush.xpose.msk.msra.mxu1 %vm435_vm0, %v427_v5 }
  0x74   : > { %1504 = vmatmul.msk.f32.vlgmr.msra.gmra.mxu0 %vm435_vm0, %v425_v6  ;;  %1505 = vmatmul.msk.f32.vlgmr.msra.gmra.mxu1 %vm435_vm0, %v426_v7 }
  0xf1   : > { %v471_v9 = vpop.f32.mrf.mxu0  ;;  %v474_v10 = vpop.f32.mrf.mxu1 }
  0xf2   : > { %v472_v11 = vadd.f32 %v1697_v8, %v471_v9  ;;  %v475_v12 = vadd.f32 %v1697_v8, %v474_v10 }
  0xf4   : > { %v477_v13 = vmul.f32 0.35355338, %v472_v11  ;;  %v478_v14 = vmul.f32 0.35355338, %v475_v12 }
  0xf6   : > { %479 = vst.msk [vmem:[#allocation2] sm:$0xff] %vm435_vm0, %v477_v13 }
  0xf7   : > { %480 = vst.msk [vmem:[#allocation2 + $0x8] sm:$0xff] %vm435_vm0, %v478_v14 }
  0xf8 PF: > { %s2773_s24 = sld [smem:[#allocation22_spill]]  ;;  %v488_v15 = vld [vmem:[%s357_s16] sm:$0xff]  ;;  %vm498_vm2 = vcmask 64512   ;;  %v490_v18 = vlaneseq  ;;  %s2043_s19 = smov 120   ;;  %v2044_v28 = vmov 0   ;;  %v2386_v29 = vld [vmem:[#allocation3] sm:$0xff] }
  0xf9   : > { %1507 = vmatpush.xpose.msk.msra.mxu0 %vm498_vm2, %v488_v15  ;;  %1698 = vset.pattern.permute.xlu1 %v2044_v28  ;;  %vm581_vm4 = vcmask 7168   ;;  %v2396_v33 = vld [vmem:[#allocation3 + $0x8] sm:$0xff]  ;;  %s2045_s26 = smov 112   ;;  %s2046_s11 = smov 104   ;;  %v2047_v10 = vmov 1   ;;  %v2048_v11 = vmov 2  }
  0xfa   : > { %v491_v19 = vand.u32 127, %v490_v18  ;;  %1699 = vset.pattern.permute.xlu2 %v2044_v28  ;;  %v2415_v38 = vld [vmem:[%s367_s20] sm:$0xff]  ;;  %1700 = vset.pattern.permute.xlu0 %v2047_v10  ;;  %vm720_vm5 = vcmask 15368   ;;  %vm872_vm6 = vcmask 23568   ;;  %vm1023_vm7 = vcmask 31768   ;;  %s2050_s14 = smov 8  }
  0xfb   : > { %619 = vmatpush.msra.mxu1 %v2415_v38  ;;  %s2051_s6 = smov 16   ;;  %vm780_vm8 = vcmask 130112   ;;  %vm931_vm9 = vcmask 195712   ;;  %s2052_s21 = smov 24   ;;  %vm1082_vm10 = vcmask 261312  }
  0xfd   : > { %v496_v16 = vld [vmem:[#allocation2] sm:$0xff] }
  0xfe   : > { %1508 = vmatmul.msk.f32.vlgmr.msra.gmra.mxu0 %vm498_vm2, %v496_v16  ;;  %v497_v17 = vld [vmem:[#allocation2 + $0x8] sm:$0xff]  ;;  %s1506_s15 = sshll.u32 %s2773_s24, 3  ;;  %637 = vrot.lane.b32.xlu2 %v496_v16, %s2043_s19  ;;  %p1527_p1 = scmp.ne.s32.totalorder %s2773_s24, 1 }
  0xff   : > { %v493_v20 = vstv %s1506_s15  ;;  %s2774_s9 = sld [smem:[#allocation35_spill]] (!%p1527_p1) }
 0x100   : > { %v2374_v21 = vadd.s32 %v493_v20, %v491_v19 }
 0x102   : > { %vm495_vm3 = vcmp.lt.s32.totalorder %v2374_v21, 14 }
 0x106   : > { %1509 = vmatmul.msk.f32.gmra.mxu0 %vm498_vm2, %v497_v17 }
 0x158   : > { %v638_v37 = vpop.permute.xlu2 %637 }
 0x17b   : > { %v525_v22 = vpop.f32.mrf.mxu0 }
 0x17c   : > { %v533_v23 = vsel %vm495_vm3, %v525_v22, -1e+30 }
 0x17d   : > { %v537_v24 = vsel %vm498_vm2, %v533_v23, -inf }
 0x17e   : > { %538 = vmax.xlane.f32.xlu0 %v537_v24 }
 0x183   : > { %v528_v25 = vpop.f32.mrf.mxu0 }
 0x184   : > { %v534_v26 = vsel %vm495_vm3, %v528_v25, -1e+30 }
 0x185   : > { %v540_v27 = vsel %vm498_vm2, %v534_v26, -inf }
 0x186   : > { %541 = vmax.xlane.f32.xlu0 %v540_v27 }
 0x19a   : > { %639 = vrot.lane.b32.xlu0 %v497_v17, %s2043_s19 }
 0x1f1   : > { %v539_v30 = vpop.xlane.xlu0 %538 }
 0x1f2   : > { %v2389_v31 = vmax.f32 %v2386_v29, %v539_v30 }
 0x1f4   : > { %v545_v32 = vsub.f32 %v2386_v29, %v2389_v31  ;;  %631 = vst.msk [vmem:[#allocation3] sm:$0xff] %vm581_vm4, %v2389_v31  ;;  %553 = vperm.xlu1 %1698, %v2389_v31  }
 0x1f9   : > { %v542_v34 = vpop.xlane.xlu0 %541 }
 0x1fa   : > { %v2399_v35 = vmax.f32 %v2396_v33, %v542_v34 }
 0x1fb   : > { %v674_v12 = vld [vmem:[#allocation3] sm:$0xff] }
 0x1fc   : > { %v546_v36 = vsub.f32 %v2396_v33, %v2399_v35  ;;  %632 = vst.msk [vmem:[#allocation3 + $0x8] sm:$0xff] %vm581_vm4, %v2399_v35  ;;  %641 = vrot.lane.b32.xlu1 %v488_v15, %s2043_s19  ;;  %558 = vperm.xlu2 %1699, %v2399_v35  }
 0x1fd   : > { %1703 = vset.pattern.permute.xlu1 %v2048_v11 }
 0x204   : > { %793 = vrot.lane.b32.xlu1 %v488_v15, %s2045_s26  ;;  %789 = vrot.lane.b32.xlu2 %v496_v16, %s2045_s26 }
 0x205   : > { %1701 = vset.pattern.permute.xlu2 %v2047_v10 }
 0x20c   : > { %791 = vrot.lane.b32.xlu1 %v497_v17, %s2045_s26  ;;  %944 = vrot.lane.b32.xlu2 %v488_v15, %s2046_s11  ;;  %v640_v52 = vpop.permute.xlu0 %639 }
 0x214   : > { %940 = vrot.lane.b32.xlu1 %v496_v16, %s2046_s11  ;;  %942 = vrot.lane.b32.xlu2 %v497_v17, %s2046_s11  ;;  %v2479_v16 = vld [vmem:[#allocation3 + $0x8] sm:$0xff] }
 0x256   : > { %v559_v39 = vpop.permute.xlu2 %558 }
 0x257   : > { %v562_v44 = vsub.f32 %v534_v26, %v559_v39  ;;  %v549_v39 = vmul.f32 1.442695, %v546_v36 }
 0x259   : > { %v565_v46 = vmul.f32 1.442695, %v562_v44 }
 0x25e   : > { %v790_v40 = vpop.permute.xlu2 %789 }
 0x266   : > { %v554_v41 = vpop.permute.xlu1 %553  ;;  %v945_v42 = vpop.permute.xlu2 %944 }
 0x267   : > { %v561_v43 = vsub.f32 %v533_v23, %v554_v41  ;;  %1522 = vmatpush.xpose.msk.msrb.mxu0 %vm498_vm2, %v945_v42 }
 0x269   : > { %v563_v45 = vmul.f32 1.442695, %v561_v43 }
 0x26b   : > { %1713 = vpow2.f32 %v563_v45 }
 0x26c   : > { %1715 = vpow2.f32 %v565_v46 }
 0x26e   : > { %v642_v47 = vpop.permute.xlu1 %641  ;;  %v943_v56 = vpop.permute.xlu2 %942 }
 0x26f   : > { %1512 = vmatpush.xpose.msk.msra.mxu2 %vm498_vm2, %v642_v47 }
 0x271   : > { %v1714_v48 = vpop.eup %1713 }
 0x272   : > { %1513 = vmatmul.msk.f32.vlgmr.msra.gmra.mxu2 %vm498_vm2, %v638_v37  ;;  %v2423_v49 = vsel %vm495_vm3, %v1714_v48, 0.0  ;;  %v1716_v51 = vpop.eup %1715  ;;  %v547_v37 = vmul.f32 1.442695, %v545_v32 }
 0x273   : > { %1510 = vmatmul.msk.f32.vlgmr.msra.gmra.mxu1 %vm498_vm2, %v2423_v49  ;;  %v2431_v53 = vsel %vm495_vm3, %v1716_v51, 0.0 }
 0x274   : > { %1717 = vpow2.f32 %v547_v37 }
 0x275   : > { %1719 = vpow2.f32 %v549_v39 }
 0x276   : > { %v794_v50 = vpop.permute.xlu1 %793 }
 0x277   : > { %1517 = vmatpush.xpose.msk.msrb.mxu1 %vm498_vm2, %v794_v50 }
 0x27a   : > { %1514 = vmatmul.msk.f32.gmra.mxu2 %vm498_vm2, %v640_v52 }
 0x27b   : > { %1511 = vmatmul.msk.f32.gmra.mxu1 %vm498_vm2, %v2431_v53 }
 0x27e   : > { %v792_v54 = vpop.permute.xlu1 %791 }
 0x283   : > { %1518 = vmatmul.msk.f32.vlgmr.msrb.gmra.mxu1 %vm498_vm2, %v790_v40  ;;  %v2525_v40 = vpop.eup %1717 }
 0x284   : > { %v2528_v41 = vpop.eup %1719 }
 0x286   : > { %v941_v55 = vpop.permute.xlu1 %940 }
 0x287   : > { %1523 = vmatmul.msk.f32.vlgmr.msrb.gmra.mxu0 %vm498_vm2, %v941_v55 }
 0x28b   : > { %1519 = vmatmul.msk.f32.gmra.mxu1 %vm498_vm2, %v792_v54  ;;  %v2049_v54 = vmov 3  }
 0x28f   : > { %1524 = vmatmul.msk.f32.gmra.mxu0 %vm498_vm2, %v943_v56 }
 0x2f0   : > { %v2439_v57 = vpop.f32.mrf.mxu1 }
 0x2f5   : > { %v666_v58 = vpop.f32.mrf.mxu2 }
 0x2f6   : > { %v2443_v59 = vsel %vm495_vm3, %v666_v58, -1e+30 }
 0x2f7   : > { %v676_v60 = vsel %vm498_vm2, %v2443_v59, -inf }
 0x2f8   : > { %677 = vmax.xlane.f32.xlu0 %v676_v60  ;;  %v2447_v62 = vpop.f32.mrf.mxu1 }
 0x2fd   : > { %v669_v61 = vpop.f32.mrf.mxu2 }
 0x2fe   : > { %v2451_v63 = vsel %vm495_vm3, %v669_v61, -1e+30 }
 0x2ff   : > { %v679_v0 = vsel %vm498_vm2, %v2451_v63, -inf }
 0x300   : > { %680 = vmax.xlane.f32.xlu1 %v679_v0  ;;  %v818_v4 = vpop.f32.mrf.mxu1 }
 0x301   : > { %v2463_v5 = vsel %vm495_vm3, %v818_v4, -1e+30  ;;  %v584_v4 = vld [vmem:[#allocation5] sm:$0xff] }
 0x302   : > { %v828_v6 = vsel %vm498_vm2, %v2463_v5, -inf }
 0x304   : > { %v969_v1 = vpop.f32.mrf.mxu0 }
 0x305   : > { %v2457_v2 = vsel %vm495_vm3, %v969_v1, -1e+30 }
 0x306   : > { %v979_v3 = vsel %vm498_vm2, %v2457_v2, -inf }
 0x307   : > { %980 = vmax.xlane.f32.xlu2 %v979_v3 }
 0x30c   : > { %v972_v7 = vpop.f32.mrf.mxu0 }
 0x30d   : > { %v2469_v8 = vsel %vm495_vm3, %v972_v7, -1e+30 }
 0x30e   : > { %v982_v9 = vsel %vm498_vm2, %v2469_v8, -inf }
 0x30f   : > { %829 = vmax.xlane.f32.xlu2 %v828_v6  ;;  %983 = vmax.xlane.f32.xlu1 %v982_v9  ;;  %v585_v9 = vld [vmem:[#allocation5 + $0x8] sm:$0xff] }
 0x328   : > { %738 = vrot.lane.b32.xlu1 %v2415_v38, %s2043_s19 }
 0x36b   : > { %v678_v13 = vpop.xlane.xlu0 %677 }
 0x36c   : > { %v682_v14 = vmax.f32 %v674_v12, %v678_v13 }
 0x36e   : > { %v684_v15 = vsub.f32 %v674_v12, %v682_v14  ;;  %783 = vst.msk [vmem:[#allocation3] sm:$0xff] %vm720_vm5, %v682_v14  ;;  %692 = vperm.xlu0 %1700, %v682_v14  }
 0x370   : > { %v686_v31 = vmul.f32 1.442695, %v684_v15  ;;  %v570_v15 = vld [vmem:[#allocation4 + $0x8] sm:$0xff] }
 0x372   : > { %1721 = vpow2.f32 %v686_v31 }
 0x373   : > { %v681_v17 = vpop.xlane.xlu1 %680 }
 0x374   : > { %v2482_v18 = vmax.f32 %v2479_v16, %v681_v17  ;;  %v572_v17 = vmul.f32 %v2528_v41, %v570_v15 }
 0x375   : > { %v2491_v23 = vld [vmem:[#allocation3] sm:$0xff] }
 0x376   : > { %v685_v19 = vsub.f32 %v2479_v16, %v2482_v18  ;;  %784 = vst.msk [vmem:[#allocation3 + $0x8] sm:$0xff] %vm720_vm5, %v2482_v18  ;;  %697 = vperm.xlu2 %1701, %v2482_v18   ;;  %1705 = vset.pattern.permute.xlu0 %v2044_v28  ;;  %v821_v28 = vpop.f32.mrf.mxu1 }
 0x377   : > { %v2513_v30 = vsel %vm495_vm3, %v821_v28, -1e+30 }
 0x378   : > { %v831_v34 = vsel %vm498_vm2, %v2513_v30, -inf  ;;  %v2533_v33 = vpop.eup %1721  ;;  %v688_v39 = vmul.f32 1.442695, %v685_v19 }
 0x37a   : > { %v981_v20 = vpop.xlane.xlu2 %980 }
 0x37d   : > { %v827_v60 = vld [vmem:[#allocation3 + $0x8] sm:$0xff] }
 0x37e   : > { %1702 = vset.pattern.permute.xlu2 %v2048_v11 }
 0x382   : > { %v830_v22 = vpop.xlane.xlu2 %829  ;;  %v984_v29 = vpop.xlane.xlu1 %983 }
 0x383   : > { %v2494_v24 = vmax.f32 %v2491_v23, %v830_v22 }
 0x385   : > { %v836_v25 = vsub.f32 %v2491_v23, %v2494_v24  ;;  %934 = vst.msk [vmem:[#allocation3] sm:$0xff] %vm872_vm6, %v2494_v24  ;;  %844 = vperm.xlu2 %1702, %v2494_v24  }
 0x38c   : > { %v2501_v26 = vld [vmem:[#allocation3] sm:$0xff] }
 0x38d   : > { %889 = vrot.lane.b32.xlu2 %v2415_v38, %s2045_s26  ;;  %v2506_v27 = vmax.f32 %v2501_v26, %v981_v20 }
 0x38e   : > { %1707 = vset.pattern.permute.xlu2 %v2047_v10 }
 0x38f   : > { %1085 = vst.msk [vmem:[#allocation3] sm:$0xff] %vm1023_vm7, %v2506_v27 }
 0x395   : > { %1040 = vrot.lane.b32.xlu2 %v2415_v38, %s2046_s11  ;;  %v576_v38 = vsel %vm498_vm2, %v2431_v53, 0.0 }
 0x398   : > { %832 = vmax.xlane.f32.xlu0 %v831_v34 }
 0x39a   : > { %v739_v32 = vpop.permute.xlu1 %738 }
 0x39b   : > { %762 = vmatpush.msra.mxu3 %v739_v32  ;;  %v987_v32 = vsub.f32 %v2501_v26, %v2506_v27 }
 0x39d   : > { %v989_v24 = vmul.f32 1.442695, %v987_v32 }
 0x3ac   : > { %588 = vperm.xlu0 %1705, %v2525_v40  }
 0x3b4   : > { %593 = vperm.xlu0 %1705, %v2528_v41  }
 0x3bc   : > { %1706 = vset.pattern.permute.xlu0 %v2049_v54 }
 0x3be   : > { %577 = vadd.xlane.f32.xlu2 %v576_v38  ;;  %v838_v38 = vmul.f32 1.442695, %v836_v25 }
 0x3d0   : > { %v698_v35 = vpop.permute.xlu2 %697 }
 0x3d1   : > { %v701_v44 = vsub.f32 %v2451_v63, %v698_v35 }
 0x3d3   : > { %v704_v46 = vmul.f32 1.442695, %v701_v44 }
 0x3d6   : > { %727 = vperm.xlu2 %1707, %v2533_v33  }
 0x3de   : > { %1712 = vset.pattern.permute.xlu2 %v2049_v54 }
 0x3df   : > { %v845_v36 = vpop.permute.xlu2 %844 }
 0x3e0   : > { %v693_v42 = vpop.permute.xlu0 %692  ;;  %v852_v50 = vsub.f32 %v2463_v5, %v845_v36 }
 0x3e1   : > { %v700_v43 = vsub.f32 %v2443_v59, %v693_v42 }
 0x3e2   : > { %v854_v52 = vmul.f32 1.442695, %v852_v50 }
 0x3e3   : > { %v702_v45 = vmul.f32 1.442695, %v700_v43 }
 0x3e5   : > { %1723 = vpow2.f32 %v702_v45 }
 0x3e6   : > { %1725 = vpow2.f32 %v704_v46 }
 0x3e7   : > { %v890_v47 = vpop.permute.xlu2 %889  ;;  %1727 = vpow2.f32 %v854_v52 }
 0x3e8   : > { %913 = vmatpush.msrb.mxu3 %v890_v47 }
 0x3eb   : > { %v1724_v48 = vpop.eup %1723 }
 0x3ec   : > { %v706_v51 = vsel %vm495_vm3, %v1724_v48, 0.0  ;;  %v1726_v53 = vpop.eup %1725 }
 0x3ed   : > { %1515 = vmatmul.msk.f32.vlgmr.msra.gmra.mxu3 %vm498_vm2, %v706_v51  ;;  %v707_v55 = vsel %vm495_vm3, %v1726_v53, 0.0  ;;  %v1728_v56 = vpop.eup %1727 }
 0x3ee   : > { %v858_v58 = vsel %vm495_vm3, %v1728_v56, 0.0  ;;  %v715_v34 = vsel %vm498_vm2, %v707_v55, 0.0 }
 0x3ef   : > { %v1041_v59 = vpop.permute.xlu2 %1040  ;;  %v864_v16 = vsel %vm498_vm2, %v858_v58, 0.0 }
 0x3f0   : > { %1064 = vmatpush.msrb.mxu2 %v1041_v59 }
 0x3f5   : > { %1516 = vmatmul.msk.f32.gmra.mxu3 %vm498_vm2, %v707_v55 }
 0x3fd   : > { %1520 = vmatmul.msk.f32.vlgmr.msrb.gmra.mxu3 %vm498_vm2, %v858_v58 }
 0x40b   : > { %v833_v61 = vpop.xlane.xlu0 %832 }
 0x40c   : > { %v835_v63 = vmax.f32 %v827_v60, %v833_v61 }
 0x40e   : > { %935 = vst.msk [vmem:[#allocation3 + $0x8] sm:$0xff] %vm872_vm6, %v835_v63  ;;  %849 = vperm.xlu1 %1703, %v835_v63   ;;  %v837_v28 = vsub.f32 %v827_v60, %v835_v63 }
 0x415   : > { %v2549_v0 = vld [vmem:[#allocation3 + $0x8] sm:$0xff] }
 0x416   : > { %1704 = vset.pattern.permute.xlu1 %v2049_v54  ;;  %v2552_v1 = vmax.f32 %v2549_v0, %v984_v29 }
 0x417   : > { %995 = vperm.xlu1 %1704, %v2506_v27  }
 0x418   : > { %1000 = vperm.xlu0 %1706, %v2552_v1   ;;  %v988_v3 = vsub.f32 %v2549_v0, %v2552_v1  ;;  %1086 = vst.msk [vmem:[#allocation3 + $0x8] sm:$0xff] %vm1023_vm7, %v2552_v1 }
 0x41a   : > { %v991_v50 = vmul.f32 1.442695, %v988_v3 }
 0x41e   : > { %v589_v5 = vpop.permute.xlu0 %588 }
 0x41f   : > { %v596_v6 = vmul.f32 %v589_v5, %v584_v4  ;;  %1708 = vset.pattern.permute.xlu1 %v2047_v10  ;;  %v573_v10 = vsel %vm498_vm2, %v2423_v49, 0.0 }
 0x420   : > { %1710 = vset.pattern.permute.xlu0 %v2048_v11 }
 0x421   : > { %v627_v7 = vadd.f32 %v2439_v57, %v596_v6  ;;  %v712_v57 = vsel %vm498_vm2, %v706_v51, 0.0  ;;  %v569_v51 = vld [vmem:[#allocation4] sm:$0xff] }
 0x422   : > { %v571_v52 = vmul.f32 %v2525_v40, %v569_v51 }
 0x423   : > { %629 = vst.msk [vmem:[#allocation5] sm:$0xff] %vm498_vm2, %v627_v7 }
 0x426   : > { %v594_v12 = vpop.permute.xlu0 %593 }
 0x427   : > { %v597_v13 = vmul.f32 %v594_v12, %v585_v9 }
 0x429   : > { %v628_v14 = vadd.f32 %v2447_v62, %v597_v13  ;;  %v840_v62 = vmul.f32 1.442695, %v837_v28 }
 0x42a   : > { %v723_v40 = vld [vmem:[#allocation5] sm:$0xff] }
 0x42b   : > { %630 = vst.msk [vmem:[#allocation5 + $0x8] sm:$0xff] %vm498_vm2, %v628_v14  ;;  %1729 = vpow2.f32 %v840_v62 }
 0x42c   : > { %1731 = vpow2.f32 %v688_v39 }
 0x42d   : > { %1733 = vpow2.f32 %v838_v38 }
 0x431   : > { %v578_v20 = vpop.xlane.xlu2 %577  ;;  %v2572_v37 = vpop.eup %1729 }
 0x432   : > { %v580_v22 = vadd.f32 %v578_v20, %v572_v17  ;;  %v1732_v49 = vpop.eup %1731  ;;  %v724_v7 = vld [vmem:[#allocation5 + $0x8] sm:$0xff] }
 0x433   : > { %v2585_v18 = vpop.eup %1733 }
 0x434   : > { %583 = vst.msk [vmem:[#allocation4 + $0x8] sm:$0xff] %vm581_vm4, %v580_v22 }
 0x439   : > { %v728_v1 = vpop.permute.xlu2 %727 }
 0x43a   : > { %v735_v3 = vmul.f32 %v728_v1, %v723_v40 }
 0x43b   : > { %v709_v55 = vld [vmem:[#allocation4 + $0x8] sm:$0xff] }
 0x43c   : > { %v711_v56 = vmul.f32 %v1732_v49, %v709_v55 }
 0x441   : > { %574 = vadd.xlane.f32.xlu1 %v573_v10 }
 0x442   : > { %713 = vadd.xlane.f32.xlu0 %v712_v57 }
 0x449   : > { %716 = vadd.xlane.f32.xlu1 %v715_v34 }
 0x456   : > { %884 = vperm.xlu0 %1710, %v2572_v37  }
 0x45e   : > { %1711 = vset.pattern.permute.xlu0 %v2049_v54 }
 0x462   : > { %732 = vperm.xlu1 %1708, %v1732_v49  }
 0x46a   : > { %1709 = vset.pattern.permute.xlu1 %v2048_v11 }
 0x470   : > { %v764_v41 = vpop.f32.mrf.mxu3 }
 0x471   : > { %772 = vrot.lane.b32.xlu2 %v764_v41, %s2050_s14 }
 0x478   : > { %v767_v29 = vpop.f32.mrf.mxu3 }
 0x479   : > { %774 = vrot.lane.b32.xlu1 %v767_v29, %s2050_s14 }
 0x480   : > { %v850_v19 = vpop.permute.xlu1 %849  ;;  %865 = vadd.xlane.f32.xlu0 %v864_v16  ;;  %v915_v23 = vpop.f32.mrf.mxu3 }
 0x481   : > { %v853_v11 = vsub.f32 %v2513_v30, %v850_v19  ;;  %879 = vperm.xlu1 %1709, %v2585_v18  }
 0x483   : > { %v856_v31 = vmul.f32 1.442695, %v853_v11 }
 0x485   : > { %1735 = vpow2.f32 %v856_v31 }
 0x486   : > { %1737 = vpow2.f32 %v989_v24 }
 0x489   : > { %v996_v25 = vpop.permute.xlu1 %995  ;;  %923 = vrot.lane.b32.xlu1 %v915_v23, %s2051_s6 }
 0x48a   : > { %v1003_v35 = vsub.f32 %v2457_v2, %v996_v25  ;;  %v1001_v36 = vpop.permute.xlu0 %1000 }
 0x48b   : > { %v1736_v42 = vpop.eup %1735  ;;  %v1004_v30 = vsub.f32 %v2469_v8, %v1001_v36 }
 0x48c   : > { %v1005_v43 = vmul.f32 1.442695, %v1003_v35  ;;  %v859_v44 = vsel %vm495_vm3, %v1736_v42, 0.0  ;;  %v2597_v27 = vpop.eup %1737 }
 0x48d   : > { %1521 = vmatmul.msk.f32.gmra.mxu3 %vm498_vm2, %v859_v44  ;;  %v1007_v26 = vmul.f32 1.442695, %v1004_v30  ;;  %v867_v8 = vsel %vm498_vm2, %v859_v44, 0.0 }
 0x48e   : > { %1739 = vpow2.f32 %v1005_v43 }
 0x48f   : > { %1741 = vpow2.f32 %v1007_v26 }
 0x490   : > { %1743 = vpow2.f32 %v991_v50 }
 0x494   : > { %v1740_v45 = vpop.eup %1739  ;;  %1030 = vperm.xlu0 %1711, %v2597_v27  }
 0x495   : > { %v2602_v2 = vsel %vm495_vm3, %v1740_v45, 0.0  ;;  %v1742_v46 = vpop.eup %1741 }
 0x496   : > { %1525 = vmatmul.msk.f32.vlgmr.msrb.gmra.mxu2 %vm498_vm2, %v2602_v2  ;;  %v1010_v47 = vsel %vm495_vm3, %v1742_v46, 0.0  ;;  %v1744_v21 = vpop.eup %1743 }
 0x497   : > { %v1018_v48 = vsel %vm498_vm2, %v1010_v47, 0.0 }
 0x49a   : > { %868 = vadd.xlane.f32.xlu2 %v867_v8 }
 0x49e   : > { %1526 = vmatmul.msk.f32.gmra.mxu2 %vm498_vm2, %v1010_v47 }
 0x4a2   : > { %1019 = vadd.xlane.f32.xlu2 %v1018_v48 }
 0x4b4   : > { %v575_v53 = vpop.xlane.xlu1 %574 }
 0x4b5   : > { %v579_v54 = vadd.f32 %v575_v53, %v571_v52  ;;  %v714_v63 = vpop.xlane.xlu0 %713 }
 0x4b7   : > { %582 = vst.msk [vmem:[#allocation4] sm:$0xff] %vm581_vm4, %v579_v54 }
 0x4ba   : > { %1035 = vperm.xlu2 %1712, %v1744_v21  }
 0x4bc   : > { %v717_v58 = vpop.xlane.xlu1 %716 }
 0x4bd   : > { %v719_v59 = vadd.f32 %v717_v58, %v711_v56 }
 0x4be   : > { %v708_v60 = vld [vmem:[#allocation4] sm:$0xff] }
 0x4bf   : > { %v710_v61 = vmul.f32 %v2533_v33, %v708_v60  ;;  %722 = vst.msk [vmem:[#allocation4 + $0x8] sm:$0xff] %vm720_vm5, %v719_v59 }
 0x4c1   : > { %v718_v0 = vadd.f32 %v714_v63, %v710_v61 }
 0x4c3   : > { %721 = vst.msk [vmem:[#allocation4] sm:$0xff] %vm720_vm5, %v718_v0 }
 0x4c6   : > { %v861_v62 = vld [vmem:[#allocation4 + $0x8] sm:$0xff] }
 0x4c7   : > { %v863_v39 = vmul.f32 %v2572_v37, %v861_v62  ;;  %v1015_v37 = vsel %vm498_vm2, %v2602_v2, 0.0 }
 0x4c8   : > { %v885_v12 = vpop.permute.xlu0 %884 }
 0x4ca   : > { %v860_v14 = vld [vmem:[#allocation4] sm:$0xff] }
 0x4cb   : > { %v773_v4 = vpop.permute.xlu2 %772  ;;  %v862_v15 = vmul.f32 %v2585_v18, %v860_v14 }
 0x4cc   : > { %v778_v5 = vadd.f32 %v773_v4, %v735_v3 }
 0x4ce   : > { %781 = vst.msk [vmem:[#allocation5] sm:$0xff] %vm780_vm8, %v778_v5 }
 0x4d4   : > { %v733_v6 = vpop.permute.xlu1 %732 }
 0x4d5   : > { %v736_v9 = vmul.f32 %v733_v6, %v724_v7  ;;  %v875_v10 = vld [vmem:[#allocation5] sm:$0xff] }
 0x4eb   : > { %v775_v13 = vpop.permute.xlu1 %774 }
 0x4ec   : > { %v779_v33 = vadd.f32 %v775_v13, %v736_v9 }
 0x4ee   : > { %782 = vst.msk [vmem:[#allocation5 + $0x8] sm:$0xff] %vm780_vm8, %v779_v33 }
 0x4f3   : > { %v866_v17 = vpop.xlane.xlu0 %865  ;;  %v880_v20 = vpop.permute.xlu1 %879 }
 0x4f4   : > { %v870_v22 = vadd.f32 %v866_v17, %v862_v15  ;;  %v887_v57 = vmul.f32 %v880_v20, %v875_v10 }
 0x4f5   : > { %v876_v32 = vld [vmem:[#allocation5 + $0x8] sm:$0xff] }
 0x4f6   : > { %873 = vst.msk [vmem:[#allocation4] sm:$0xff] %vm872_vm6, %v870_v22  ;;  %v888_v23 = vmul.f32 %v885_v12, %v876_v32 }
 0x4fb   : > { %v924_v28 = vpop.permute.xlu1 %923 }
 0x4fc   : > { %v929_v34 = vadd.f32 %v924_v28, %v887_v57 }
 0x4fd   : > { %v1011_v46 = vld [vmem:[#allocation4] sm:$0xff] }
 0x4fe   : > { %932 = vst.msk [vmem:[#allocation5] sm:$0xff] %vm931_vm9, %v929_v34  ;;  %v1013_v47 = vmul.f32 %v2597_v27, %v1011_v46 }
 0x505   : > { %v1026_v36 = vld [vmem:[#allocation5] sm:$0xff] }
 0x506   : > { %v1031_v25 = vpop.permute.xlu0 %1030 }
 0x507   : > { %v1038_v42 = vmul.f32 %v1031_v25, %v1026_v36 }
 0x50d   : > { %v869_v49 = vpop.xlane.xlu2 %868 }
 0x50e   : > { %v871_v41 = vadd.f32 %v869_v49, %v863_v39 }
 0x510   : > { %874 = vst.msk [vmem:[#allocation4 + $0x8] sm:$0xff] %vm872_vm6, %v871_v41  ;;  %v918_v38 = vpop.f32.mrf.mxu3 }
 0x511   : > { %925 = vrot.lane.b32.xlu1 %v918_v38, %s2051_s6 }
 0x515   : > { %v1020_v18 = vpop.xlane.xlu2 %1019 }
 0x517   : > { %v1012_v29 = vld [vmem:[#allocation4 + $0x8] sm:$0xff] }
 0x518   : > { %v1014_v16 = vmul.f32 %v1744_v21, %v1012_v29 }
 0x519   : > { %v1066_v19 = vpop.f32.mrf.mxu2 }
 0x51a   : > { %v1022_v11 = vadd.f32 %v1020_v18, %v1014_v16  ;;  %1074 = vrot.lane.b32.xlu0 %v1066_v19, %s2052_s21 }
 0x51c   : > { %1025 = vst.msk [vmem:[#allocation4 + $0x8] sm:$0xff] %vm1023_vm7, %v1022_v11 }
 0x51d   : > { %v1036_v26 = vpop.permute.xlu2 %1035 }
 0x521   : > { %v1069_v31 = vpop.f32.mrf.mxu2 }
 0x522   : > { %1076 = vrot.lane.b32.xlu0 %v1069_v31, %s2052_s21 }
 0x53b   : > { %1016 = vadd.xlane.f32.xlu1 %v1015_v37 }
 0x583   : > { %v926_v24 = vpop.permute.xlu1 %925 }
 0x584   : > { %v930_v35 = vadd.f32 %v926_v24, %v888_v23 }
 0x586   : > { %933 = vst.msk [vmem:[#allocation5 + $0x8] sm:$0xff] %vm931_vm9, %v930_v35 }
 0x58c   : > { %v1075_v43 = vpop.permute.xlu0 %1074 }
 0x58d   : > { %v1080_v30 = vadd.f32 %v1075_v43, %v1038_v42  ;;  %v1027_v44 = vld [vmem:[#allocation5 + $0x8] sm:$0xff] }
 0x58e   : > { %v1039_v45 = vmul.f32 %v1036_v26, %v1027_v44 }
 0x58f   : > { %1083 = vst.msk [vmem:[#allocation5] sm:$0xff] %vm1082_vm10, %v1080_v30 }
 0x594   : > { %v1077_v8 = vpop.permute.xlu0 %1076 }
 0x595   : > { %v1081_v2 = vadd.f32 %v1077_v8, %v1039_v45 }
 0x597   : > { %1084 = vst.msk [vmem:[#allocation5 + $0x8] sm:$0xff] %vm1082_vm10, %v1081_v2 }
 0x5ad   : > { %1090 = sbr.rel (%p1527_p1) target bundleno = 1774 (0x6ee), region = 76 }
 0x5ae   : > { %v1017_v48 = vpop.xlane.xlu1 %1016 }
 0x5af   : > { %v1021_v50 = vadd.f32 %v1017_v48, %v1013_v47 }
 0x5b1   : > { %1024 = vst.msk [vmem:[#allocation4] sm:$0xff] %vm1023_vm7, %v1021_v50 }
 0x5b2   : > { %v1094_v52 = vld [vmem:[#allocation4 + $0x8] sm:$0xff]  ;;  %v2053_v53 = vmov 0   ;;  %v2054_v54 = vmov 1   ;;  %v2055_v55 = vmov 2   ;;  %v2056_v14 = vmov 3   ;;  %v1091_v15 = vld [vmem:[#allocation5] sm:$0xff] }
 0x5b3   : > { %1745 = vset.pattern.permute.xlu0 %v2053_v53  ;;  %1746 = vset.pattern.permute.xlu1 %v2054_v54  ;;  %vm1114_vm15 = vweird.f32 %v1094_v52  ;;  %v1120_v4 = vand.u32 2147483648, %v1094_v52  ;;  %v1118_v7 = vand.u32 2147483647, %v1094_v52  ;;  %v1280_v22 = vld [vmem:[#allocation14 + $0x18] sm:$0xff]  ;;  %v1279_v10 = vld [vmem:[#allocation14 + $0x10] sm:$0xff]  ;;  %v1278_v57 = vld [vmem:[#allocation14 + $0x8] sm:$0xff] }
 0x5b4   : > { %1747 = vset.pattern.permute.xlu2 %v2055_v55  ;;  %1304 = vmatpush.msra.mxu0 %v1280_v22  ;;  %v1092_v28 = vld [vmem:[#allocation5 + $0x8] sm:$0xff]  ;;  %v1277_v34 = vld [vmem:[#allocation14] sm:$0xff] }
 0x5b5   : > { %v1121_v12 = vor.u32 1.1754944e-38, %v1120_v4  ;;  %vm1119_vm3 = vcmp.eq.f32.partialorder %v1118_v7, 8.507059e+37  ;;  %1541 = vmatpush.msra.mxu1 %v1280_v22  ;;  %v1750_v26 = vld [vmem:[%s2774_s9] ss:$0 sm:$0xff] }
 0x5b6   : > { %1305 = vmatpush.msra.mxu0 %v1279_v10 }
 0x5b7   : > { %1542 = vmatpush.msra.mxu1 %v1279_v10 }
 0x5b8   : > { %v1093_v51 = vld [vmem:[#allocation4] sm:$0xff]  ;;  %1306 = vmatpush.msra.mxu0 %v1278_v57 }
 0x5b9   : > { %1751 = vrcp.f32 %v1093_v51  ;;  %v1106_v58 = vand.u32 2147483648, %v1093_v51  ;;  %vm1100_vm11 = vweird.f32 %v1093_v51  ;;  %v1104_v61 = vand.u32 2147483647, %v1093_v51  ;;  %1543 = vmatpush.msra.mxu1 %v1278_v57 }
 0x5ba   : > { %1753 = vrcp.f32 %v1094_v52  ;;  %1307 = vmatpush.msra.mxu0 %v1277_v34 }
 0x5bb   : > { %v1107_v1 = vor.u32 1.1754944e-38, %v1106_v58  ;;  %vm1105_vm14 = vcmp.eq.f32.partialorder %v1104_v61, 8.507059e+37  ;;  %1544 = vmatpush.msra.mxu1 %v1277_v34 }
 0x5bf   : > { %v1752_v21 = vpop.eup %1751 }
 0x5c0   : > { %v1754_v56 = vpop.eup %1753  ;;  %v1096_v27 = vmul.f32 %v1752_v21, %v1093_v51  ;;  %vm1101_vm12 = vweird.f32 %v1752_v21 }
 0x5c1   : > { %v1110_v59 = vmul.f32 %v1754_v56, %v1094_v52  ;;  %vm1102_vm13 = vmor %vm1100_vm11, %vm1101_vm12  ;;  %vm1115_vm0 = vweird.f32 %v1754_v56 }
 0x5c2   : > { %v1097_v60 = vsub.f32 1.0, %v1096_v27  ;;  %vm1116_vm1 = vmor %vm1114_vm15, %vm1115_vm0 }
 0x5c3   : > { %v1111_v63 = vsub.f32 1.0, %v1110_v59 }
 0x5c4   : > { %v1098_v0 = vmul.f32 %v1752_v21, %v1097_v60 }
 0x5c5   : > { %v1112_v40 = vmul.f32 %v1754_v56, %v1111_v63 }
 0x5c6   : > { %v1099_v3 = vadd.f32 %v1752_v21, %v1098_v0 }
 0x5c7   : > { %v1113_v6 = vadd.f32 %v1754_v56, %v1112_v40 }
 0x5c8   : > { %v1103_v5 = vsel %vm1102_vm13, %v1752_v21, %v1099_v3 }
 0x5c9   : > { %v1108_v9 = vsel %vm1105_vm14, %v1107_v1, %v1103_v5  ;;  %v1117_v13 = vsel %vm1116_vm1, %v1754_v56, %v1113_v6 }
 0x5ca   : > { %1125 = vperm.xlu0 %1745, %v1108_v9   ;;  %1171 = vperm.xlu1 %1746, %v1108_v9   ;;  %v1122_v33 = vsel %vm1119_vm3, %v1121_v12, %v1117_v13 }
 0x5cb   : > { %1217 = vperm.xlu2 %1747, %v1108_v9  }
 0x5d2   : > { %1130 = vperm.xlu0 %1745, %v1122_v33   ;;  %1176 = vperm.xlu1 %1746, %v1122_v33  }
 0x5d3   : > { %1222 = vperm.xlu2 %1747, %v1122_v33  }
 0x5da   : > { %1748 = vset.pattern.permute.xlu0 %v2056_v14  ;;  %1749 = vset.pattern.permute.xlu1 %v2056_v14 }
 0x5db   : > { %1263 = vperm.xlu0 %1748, %v1108_v9   ;;  %1268 = vperm.xlu1 %1749, %v1122_v33  }
 0x625   : > { %v1218_v18 = vpop.permute.xlu2 %1217 }
 0x62d   : > { %v1223_v37 = vpop.permute.xlu2 %1222 }
 0x63c   : > { %v1126_v17 = vpop.permute.xlu0 %1125  ;;  %v1172_v62 = vpop.permute.xlu1 %1171 }
 0x63d   : > { %v1133_v20 = vmul.f32 %v1126_v17, %v1091_v15 }
 0x63f   : > { %1135 = vst.msk [vmem:[#allocation5] sm:$0xff] %vm498_vm2, %v1133_v20 }
 0x644   : > { %v1131_v39 = vpop.permute.xlu0 %1130  ;;  %v1177_v29 = vpop.permute.xlu1 %1176 }
 0x645   : > { %v1134_v49 = vmul.f32 %v1131_v39, %v1092_v28 }
 0x646   : > { %v1137_v41 = vld [vmem:[#allocation5] sm:$0xff] }
 0x647   : > { %v1179_v38 = vmul.f32 %v1172_v62, %v1137_v41  ;;  %1136 = vst.msk [vmem:[#allocation5 + $0x8] sm:$0xff] %vm498_vm2, %v1134_v49  ;;  %vm1285_vm2 = vcmask 261120  }
 0x649   : > { %1181 = vst.msk [vmem:[#allocation5] sm:$0xff] %vm780_vm8, %v1179_v38 }
 0x64d   : > { %v1264_v23 = vpop.permute.xlu0 %1263  ;;  %v1269_v36 = vpop.permute.xlu1 %1268 }
 0x64e   : > { %v1138_v16 = vld [vmem:[#allocation5 + $0x8] sm:$0xff] }
 0x64f   : > { %v1180_v19 = vmul.f32 %v1177_v29, %v1138_v16 }
 0x650   : > { %v1183_v11 = vld [vmem:[#allocation5] sm:$0xff] }
 0x651   : > { %1182 = vst.msk [vmem:[#allocation5 + $0x8] sm:$0xff] %vm780_vm8, %v1180_v19  ;;  %v1225_v31 = vmul.f32 %v1218_v18, %v1183_v11 }
 0x653   : > { %1227 = vst.msk [vmem:[#allocation5] sm:$0xff] %vm931_vm9, %v1225_v31 }
 0x658   : > { %v1184_v32 = vld [vmem:[#allocation5 + $0x8] sm:$0xff] }
 0x659   : > { %v1226_v24 = vmul.f32 %v1223_v37, %v1184_v32 }
 0x65a   : > { %v1229_v25 = vld [vmem:[#allocation5] sm:$0xff] }
 0x65b   : > { %1228 = vst.msk [vmem:[#allocation5 + $0x8] sm:$0xff] %vm931_vm9, %v1226_v24  ;;  %v1271_v35 = vmul.f32 %v1264_v23, %v1229_v25 }
 0x65d   : > { %1273 = vst.msk [vmem:[#allocation5] sm:$0xff] %vm1082_vm10, %v1271_v35 }
 0x662   : > { %v1230_v42 = vld [vmem:[#allocation5 + $0x8] sm:$0xff] }
 0x663   : > { %v1272_v43 = vmul.f32 %v1269_v36, %v1230_v42 }
 0x664   : > { %v1275_v30 = vld [vmem:[#allocation5] sm:$0xff] }
 0x665   : > { %1274 = vst.msk [vmem:[#allocation5 + $0x8] sm:$0xff] %vm1082_vm10, %v1272_v43  ;;  %1528 = vmatmul.msk.f32.vlgmr.msra.gmra.mxu0 %vm1285_vm2, %v1275_v30 }
 0x66c   : > { %v1276_v44 = vld [vmem:[#allocation5 + $0x8] sm:$0xff] }
 0x66d   : > { %1529 = vmatmul.msk.f32.vlgmr.msra.gmra.mxu1 %vm1285_vm2, %v1276_v44 }
 0x6e2   : > { %v1309_v45 = vpop.f32.mrf.mxu0 }
 0x6e3   : > { %v1310_v8 = vadd.f32 %v1750_v26, %v1309_v45 }
 0x6e5   : > { %1315 = vst.msk [vmem:[%s2345_s17] sm:$0xff] %vm1285_vm2, %v1310_v8 }
 0x6ea   : > { %v1312_v2 = vpop.f32.mrf.mxu1 }
 0x6eb   : > { %v1313_v46 = vadd.f32 %v1750_v26, %v1312_v2 }
 0x6ed   : > { %1316 = vst.msk [vmem:[%s2345_s17 + $0x8] sm:$0xff] %vm1285_vm2, %v1313_v46 }
 0x6ee PF: > { %s2775_s23 = sld [smem:[#allocation23_spill]]  ;;  %s1330_s22 = sshll.u32 %s2345_s17, 4  ;;  %s1331_s22 = int_to_ptr.vmem [resolvable:$true] %s1330_s22 }
 0x6ef   : > { %s2777_s16 = sld [smem:[#allocation36_spill]]  ;;  %s1318_s12 = scalar_lea.sflag [#allocation8], %s2321_s18 }
 0x6f4   : > { %s1536_s4 = sshll.u32 %s2775_s23, 4 }
 0x6f5   : > { %s1329_s20 = scalar_lea.hbm %s2777_s16, %s1536_s4  ;;  %s1925_s26 = scalar_lea.hbm %s2777_s16, 32 }
 0x6f6   : > { %s1332_s3 = sshll.u32 %s1329_s20, 4  ;;  %s1333_s3 = int_to_ptr.hbm [resolvable:$true] %s1332_s3 }
 0x6f7   : > { %s1919_s27 = sshra.s32 %s1333_s3, 4  ;;  %s1920_s27 = int_to_ptr.hbm [resolvable:$true] %s1919_s27 }
 0x6f8   : > { %s1921_s24 = scalar_lea.hbm %s1920_s27, 16  ;;  %p1926_p13 = scmp.lt.s32.totalorder %s1920_s27, %s2777_s16 }
 0x6f9   : > { %p1922_p7 = scmp.ne.s32.totalorder %s1920_s27, %s1921_s24  ;;  %p1927_p3 = scmp.lt.s32.totalorder %s1925_s26, %s1921_s24 }
 0x6fb   : > { %p1923_p4 = pnand %p1922_p7, %p2235_p11  ;;  %p1928_p6 = por %p1927_p3, %p1926_p13 }
 0x6fd   : > { %p1924_p12 = pneg %p1923_p4 }
 0x6ff   : > { %p1929_p9 = pnand %p1928_p6, %p1924_p12 }
 0x701   : > { %1932 = shalt.err (!%p1929_p9)
}
 0x702   : > { %s2057_s18 = smov 128  }
 0x703   : > { %1559 = dma.vmem_to_hbm [thread:$0]  (%p2235_p11), %s1331_s22, 256, %s1333_s3, %s1318_s12, %s2057_s18, %s2057_s18, %s2050_s14  }
 0x704 PF: > { %s2778_s17 = sld [smem:[#allocation25_spill]] }
 0x705   : > { %s2779_s21 = sld [smem:[#allocation21_spill]] }
 0x70a   : > { %p1587_p5 = scmp.ge.s32.totalorder %s2778_s17, 2 }
 0x70b   : > { %s1347_s5 = sand.u32 1, %s2779_s21  }
 0x70c   : > { %p1579_p10 = pnand %p1587_p5, %p2244_p8  ;;  %s1348_s9 = scalar_lea.sflag [#allocation8], %s1347_s5 }
 0x70e   : > { %p1580_p0 = pneg %p1579_p10 }
 0x710   : > { %1990 = dma.done.wait (%p1580_p0), %s1348_s9, 256  }
 0x711   : > { %1992 = vsyncadd (%p1580_p0), %s1348_s9, 4294967040  ;;  %s27_s11 = sadd.s32 1, %s2778_s17   ;;  %s2781_s23 = sld [smem:[#allocation20_spill]] }
 0x712   : > { %p24_p2 = scmp.ge.s32.totalorder %s27_s11, 6   ;;  %s2782_s26 = sld [smem:[#allocation27_spill]] }
 0x713   : > { %s2783_s30 = sld [smem:[#allocation24_spill]]  ;;  %s2785_s14 = smov %s2798_s8 }
 0x714   : > { %s2784_s9 = sld [smem:[#allocation26_spill]]  ;;  %s2786_s24 = smov %s1999_s25 }
 0x715   : > { %s2788_s27 = smov %s2011_s28  ;;  %s2789_s28 = smov %s2015_s29 }
 0x716   : > { %s2790_s29 = smov %s2311_s13  ;;  %s2791_s8 = smov %s2031_s10 }
 0x717   : > { %s2787_s25 = smov %s2781_s23  ;;  %s2792_s10 = smov %s2785_s14 }
 0x718   :  { %26 = sbr.rel (!%p24_p2) target bundleno = 20 (0x14), region = 133 }
 0x71d   :  { %1354 = vsyncpa [#allocation7], 1 }
 0x71e   :  { %1356 = vsyncpa [#allocation7 + $0x1], 1 }
 0x71f   :  { %1357 = vsyncpa [#allocation10], 1 }
 0x720   :  { %1359 = vsyncpa [#allocation10 + $0x1], 1 }
 0x721   :  { %1360 = vsyncpa [#allocation13], 1 }
 0x722   :  { %1361 = vsyncpa [#allocation8], 1 }
 0x723   :  { %1363 = vsyncpa [#allocation8 + $0x1], 1 }

</bundles_post_ra>
